<compile_context>
chip_gen: v5e
topology: v5e:2x2
jax: 0.10.0
libtpu: 0.0.40
codegen_flags: <defaults>
</compile_context>

<pallas_src>
import functools

import jax
import jax.numpy as jnp
from jax.experimental import pallas as pl
from jax.experimental.pallas import tpu as pltpu

DIMS = [162, 512, 256, 128, 64, 27]   # feature sizes through the MLP
K_PAD = 256                           # padded input-feature width (lane aligned)
OUT_PAD = 128                         # lane-dense padded output width
SLAB_W = 512                          # packed small-operand slab width
BN_EPS = 1e-5
_SUB = 16                             # batch-tile granularity (bf16 sublane pack)


# ---------------------------------------------------------------------------
# Kernel
# ---------------------------------------------------------------------------
def meta_learner_kernel(x_ref, slab_ref, w1_ref, w2_ref, w3_ref, w4_ref, w5_ref,
                        o_ref, *, epilogue_bf16):
    bf16, f32 = jnp.bfloat16, jnp.float32

    # Packed small operands (one resident slab): row 0/1 = BN0 scale/shift,
    # rows 2..5 = folded biases b1..b4, row 6 = padded b5.
    s0 = slab_ref[0:1, 0:K_PAD]
    t0 = slab_ref[1:2, 0:K_PAD]

    # BN0 affine + ReLU in f32 (Dropout == identity in eval mode).
    h = jnp.maximum(x_ref[...].astype(f32) * s0 + t0, 0.0).astype(bf16)

    layer_meta = ((w1_ref, 2, DIMS[1]), (w2_ref, 3, DIMS[2]),
                  (w3_ref, 4, DIMS[3]), (w4_ref, 5, DIMS[4]))
    for w_ref, row, width in layer_meta:
        b = slab_ref[row:row + 1, 0:width]
        acc = jnp.dot(h, w_ref[...], preferred_element_type=f32)
        if epilogue_bf16:
            # v6e/v7x: bf16-capable VPU -> half the epilogue vregs / ld-st traffic.
            h = jnp.maximum(acc.astype(bf16) + b.astype(bf16), 0.0)
        else:
            # v5e: no bf16 VPU -> keep the epilogue in f32, cast once for the MXU.
            h = jnp.maximum(acc + b, 0.0).astype(bf16)

    b5 = slab_ref[6:7, 0:OUT_PAD]
    out = jnp.dot(h, w5_ref[...], preferred_element_type=f32) + b5
    o_ref[...] = out.astype(o_ref.dtype)


# ---------------------------------------------------------------------------
# Parameters
# ---------------------------------------------------------------------------
def make_params(key):
    """Deterministic synthetic parameters with the shapes implied by __init__."""
    params = {}
    ks = iter(jax.random.split(key, 64))
    # 5 BatchNorm1d layers (over DIMS[0..4]) -> folded scale/shift
    for li, d in enumerate(DIMS[:-1]):
        gamma = 1.0 + 0.1 * jax.random.normal(next(ks), (d,), jnp.float32)
        beta = 0.1 * jax.random.normal(next(ks), (d,), jnp.float32)
        rmean = 0.1 * jax.random.normal(next(ks), (d,), jnp.float32)
        rvar = 1.0 + 0.1 * jax.random.uniform(next(ks), (d,), jnp.float32)
        scale = gamma * jax.lax.rsqrt(rvar + BN_EPS)
        shift = beta - rmean * scale
        params[f"s{li}"] = scale.reshape(1, d)
        params[f"t{li}"] = shift.reshape(1, d)
    # 5 Linear layers: (in, out) weights + (out,) bias (Kaiming-uniform-ish scale)
    for li in range(5):
        din, dout = DIMS[li], DIMS[li + 1]
        bound = 1.0 / jnp.sqrt(float(din))
        w = jax.random.uniform(next(ks), (din, dout), jnp.float32, -bound, bound)
        b = jax.random.uniform(next(ks), (dout,), jnp.float32, -bound, bound)
        params[f"w{li + 1}"] = w
        params[f"b{li + 1}"] = b.reshape(1, dout)
    return params


def fold_params(params):
    """Fold BN1..BN4 into Linear1..Linear4, cast weights to bf16, pad layer 1
    (K: 162->256) and layer 5 (N: 27->128), pack all small vectors into a slab."""
    folded = {}
    slab = jnp.zeros((8, SLAB_W), jnp.float32)
    # BN0 stays an explicit affine; zero-pad scale/shift to K_PAD columns.
    slab = slab.at[0, :DIMS[0]].set(params["s0"][0])
    slab = slab.at[1, :DIMS[0]].set(params["t0"][0])
    # Fold BN1..BN4 into the preceding Linear (W' = W*s, b' = b*s + t).
    for li in range(1, 5):
        w, b = params[f"w{li}"], params[f"b{li}"]
        s, t = params[f"s{li}"], params[f"t{li}"]
        w = w * s
        b = (b * s + t)[0]
        if li == 1:  # zero-pad the contraction dim 162 -> 256
            w = jnp.zeros((K_PAD, DIMS[1]), jnp.float32).at[:DIMS[0], :].set(w)
        folded[f"w{li}"] = w.astype(jnp.bfloat16)
        slab = slab.at[li + 1, :DIMS[li]].set(b)
    # Final Linear: zero-pad 27 -> 128 output lanes for unmasked stores.
    w5 = jnp.zeros((DIMS[4], OUT_PAD), jnp.float32).at[:, :DIMS[5]].set(params["w5"])
    folded["w5"] = w5.astype(jnp.bfloat16)
    slab = slab.at[6, :DIMS[5]].set(params["b5"][0])
    folded["slab"] = slab
    return folded


# ---------------------------------------------------------------------------
# Wrapper
# ---------------------------------------------------------------------------
def _round_up(n, m):
    return ((n + m - 1) // m) * m


def _bf16_vpu_available():
    """True on v6e/v7x-class chips (bf16 VPU); False on v5e and older."""
    try:
        kind = jax.devices()[0].device_kind.lower()
    except Exception:  # pragma: no cover - conservative default
        return True
    return not any(tag in kind for tag in ("v2", "v3", "v4", "v5"))


def _choose_tiling(B, block_b_req):
    """Pick (block_b, B_pad, n_tiles): tile multiple of 16, >=2 steps when the
    batch allows it, and an even step count (balanced v7x megacore split)."""
    Bp = _round_up(B, _SUB)
    block_b_req = _round_up(max(_SUB, min(block_b_req, Bp)), _SUB)
    n = pl.cdiv(Bp, block_b_req)
    if Bp >= 2 * _SUB:
        n = max(n, 2)          # overlap step-0 weight DMA with step-1 compute
        if n % 2:
            n += 1             # even count -> both v7x TensorCores stay busy
    block_b = _round_up(pl.cdiv(Bp, n), _SUB)
    return block_b, n * block_b, n


def meta_learner_forward(x, folded, *, block_b=None, out_dtype=jnp.bfloat16,
                         epilogue_bf16=None):
    """x: (B, 1, 162) or (B, 162). Returns (B, 27) in `out_dtype`."""
    if x.ndim == 3:
        x = jnp.squeeze(x, axis=1)   # x.squeeze_(1) in the torch forward
    B = x.shape[0]

    if epilogue_bf16 is None:
        epilogue_bf16 = _bf16_vpu_available()
    if block_b is None:
        block_b = 512 if epilogue_bf16 else 256   # smaller tiles on v5e

    block_b, B_pad, n_tiles = _choose_tiling(B, block_b)

    # Stream x as bf16 with the feature dim zero-padded 162 -> 256 (lane aligned).
    xp = jnp.zeros((B_pad, K_PAD), jnp.bfloat16)
    xp = xp.at[:B, :DIMS[0]].set(x.astype(jnp.bfloat16))

    weights = [folded[f"w{i}"] for i in range(1, 6)]

    def resident(shape):
        # Constant block index -> stays resident in VMEM across all grid steps.
        return pl.BlockSpec(shape, lambda i: (0, 0))

    in_specs = [pl.BlockSpec((block_b, K_PAD), lambda i: (i, 0)),
                resident(folded["slab"].shape)]
    in_specs += [resident(w.shape) for w in weights]
    out_spec = pl.BlockSpec((block_b, OUT_PAD), lambda i: (i, 0))

    kernel = functools.partial(meta_learner_kernel, epilogue_bf16=epilogue_bf16)

    out = pl.pallas_call(
        kernel,
        out_shape=jax.ShapeDtypeStruct((B_pad, OUT_PAD), out_dtype),
        grid_spec=pl.GridSpec(
            grid=(n_tiles,),
            in_specs=in_specs,
            out_specs=out_spec,
        ),
        compiler_params=pltpu.CompilerParams(
            dimension_semantics=("parallel",),   # shard batch tiles across TCs
        ),
    )(xp, folded["slab"], *weights)
    return out[:B, :DIMS[-1]]


# ---------------------------------------------------------------------------
# References
# ---------------------------------------------------------------------------
def reference_forward_f32(x, params):
    """Pure-JAX f32 reference of the eval-mode torch forward (unfolded params)."""
    if x.ndim == 3:
        x = jnp.squeeze(x, axis=1)
    h = x.astype(jnp.float32)
    for li in range(5):
        h = jnp.maximum(h * params[f"s{li}"] + params[f"t{li}"], 0.0)
        h = h @ params[f"w{li + 1}"] + params[f"b{li + 1}"]
    return h


def reference_forward_folded(x, folded, *, epilogue_bf16, out_dtype):
    """Pure-JAX reference replicating the exact folded / padded / bf16 dataflow."""
    if x.ndim == 3:
        x = jnp.squeeze(x, axis=1)
    B = x.shape[0]
    xp = jnp.zeros((B, K_PAD), jnp.bfloat16).at[:, :DIMS[0]].set(x.astype(jnp.bfloat16))
    slab = folded["slab"]
    s0, t0 = slab[0:1, :K_PAD], slab[1:2, :K_PAD]
    h = jnp.maximum(xp.astype(jnp.float32) * s0 + t0, 0.0).astype(jnp.bfloat16)
    for li in range(1, 5):
        b = slab[li + 1:li + 2, :DIMS[li]]
        acc = jnp.dot(h, folded[f"w{li}"], preferred_element_type=jnp.float32)
        if epilogue_bf16:
            h = jnp.maximum(acc.astype(jnp.bfloat16) + b.astype(jnp.bfloat16), 0.0)
        else:
            h = jnp.maximum(acc + b, 0.0).astype(jnp.bfloat16)
    out = (jnp.dot(h, folded["w5"], preferred_element_type=jnp.float32)
           + slab[6:7, :OUT_PAD])
    return out.astype(out_dtype)[:, :DIMS[-1]]


# ---------------------------------------------------------------------------
# Main
# ---------------------------------------------------------------------------
if __name__ == "__main__":
    key = jax.random.PRNGKey(0)
    k_param, k_x = jax.random.split(key)

    params = make_params(k_param)
    folded = fold_params(params)
    epilogue_bf16 = _bf16_vpu_available()

    for B in (64, 5):   # 64: two-tile pipelined grid; 5: padded tail path
        x = jax.random.normal(jax.random.fold_in(k_x, B), (B, 1, DIMS[0]),
                              jnp.float32)
        out = jax.block_until_ready(meta_learner_forward(x, folded))
        assert out.shape == (B, DIMS[-1]), out.shape

        # Tight check vs. a pure-JAX model using the exact folded/padded bf16
        # parameters and the same epilogue dtype the kernel used.
        ref_folded = reference_forward_folded(x, folded,
                                              epilogue_bf16=epilogue_bf16,
                                              out_dtype=out.dtype)
        assert jnp.allclose(out.astype(jnp.float32),
                            ref_folded.astype(jnp.float32),
                            atol=2e-2, rtol=2e-2), "mismatch vs folded reference"

        # Loose check vs. the original unfolded f32 forward (validates BN folding
        # + bf16 weight/activation/output casts).
        ref_f32 = reference_forward_f32(x, params)
        assert jnp.allclose(out.astype(jnp.float32), ref_f32,
                            atol=8e-2, rtol=8e-2), "mismatch vs f32 reference"

    print("KERNEL_OK")
</pallas_src>

<mosaic_0001>
module attributes {stable_mosaic.version = 11 : i64} {
  func.func @meta_learner_kernel(%arg0: i32, %arg1: memref<32x256xbf16, #tpu.memory_space<vmem>>, %arg2: memref<8x512xf32, #tpu.memory_space<vmem>>, %arg3: memref<256x512xbf16, #tpu.memory_space<vmem>>, %arg4: memref<512x256xbf16, #tpu.memory_space<vmem>>, %arg5: memref<256x128xbf16, #tpu.memory_space<vmem>>, %arg6: memref<128x64xbf16, #tpu.memory_space<vmem>>, %arg7: memref<64x128xbf16, #tpu.memory_space<vmem>>, %arg8: memref<32x128xbf16, #tpu.memory_space<vmem>>) attributes {dimension_semantics = [#tpu.dimension_semantics<parallel>], iteration_bounds = array<i64: 2>, scalar_prefetch = 0 : i64, scratch_operands = 0 : i64, tpu.core_type = #tpu.core_type<tc>, window_params = [{transform_indices = @transform_0, window_bounds = array<i64: 32, 256>}, {pipeline_mode = #tpu.pipeline_mode<synchronous>, transform_indices = @transform_1, window_bounds = array<i64: 8, 512>}, {pipeline_mode = #tpu.pipeline_mode<synchronous>, transform_indices = @transform_2, window_bounds = array<i64: 256, 512>}, {pipeline_mode = #tpu.pipeline_mode<synchronous>, transform_indices = @transform_3, window_bounds = array<i64: 512, 256>}, {pipeline_mode = #tpu.pipeline_mode<synchronous>, transform_indices = @transform_4, window_bounds = array<i64: 256, 128>}, {pipeline_mode = #tpu.pipeline_mode<synchronous>, transform_indices = @transform_5, window_bounds = array<i64: 128, 64>}, {pipeline_mode = #tpu.pipeline_mode<synchronous>, transform_indices = @transform_6, window_bounds = array<i64: 64, 128>}, {transform_indices = @transform_7, window_bounds = array<i64: 32, 128>}]} {
    %c0 = arith.constant 0 : index
    %c0_0 = arith.constant 0 : index
    %0 = vector.load %arg2[%c0, %c0_0] : memref<8x512xf32, #tpu.memory_space<vmem>>, vector<1x256xf32>
    %c1 = arith.constant 1 : index
    %c0_1 = arith.constant 0 : index
    %1 = vector.load %arg2[%c1, %c0_1] : memref<8x512xf32, #tpu.memory_space<vmem>>, vector<1x256xf32>
    %c0_2 = arith.constant 0 : index
    %c0_3 = arith.constant 0 : index
    %2 = vector.load %arg1[%c0_2, %c0_3] : memref<32x256xbf16, #tpu.memory_space<vmem>>, vector<32x256xbf16>
    %3 = arith.extf %2 : vector<32x256xbf16> to vector<32x256xf32>
    %4 = vector.broadcast %0 : vector<1x256xf32> to vector<32x256xf32>
    %5 = arith.mulf %3, %4 : vector<32x256xf32>
    %6 = vector.broadcast %1 : vector<1x256xf32> to vector<32x256xf32>
    %7 = arith.addf %5, %6 : vector<32x256xf32>
    %cst = arith.constant 0.000000e+00 : f32
    %8 = vector.broadcast %cst : f32 to vector<32x256xf32>
    %9 = arith.maximumf %7, %8 : vector<32x256xf32>
    %10 = arith.truncf %9 : vector<32x256xf32> to vector<32x256xbf16>
    %c2 = arith.constant 2 : index
    %c0_4 = arith.constant 0 : index
    %11 = vector.load %arg2[%c2, %c0_4] : memref<8x512xf32, #tpu.memory_space<vmem>>, vector<1x512xf32>
    %c0_5 = arith.constant 0 : index
    %c0_6 = arith.constant 0 : index
    %12 = vector.load %arg3[%c0_5, %c0_6] : memref<256x512xbf16, #tpu.memory_space<vmem>>, vector<256x512xbf16>
    %cst_7 = arith.constant dense<0.000000e+00> : vector<32x512xf32>
    %13 = tpu.matmul %10, %12, %cst_7 {dimension_numbers = #tpu.dot_dimension_numbers<[1], [0], [0], [1], [0, 0, 1, 1], [], []>} : vector<32x256xbf16>, vector<256x512xbf16>, vector<32x512xf32> -> vector<32x512xf32>
    %14 = arith.truncf %13 : vector<32x512xf32> to vector<32x512xbf16>
    %15 = arith.truncf %11 : vector<1x512xf32> to vector<1x512xbf16>
    %16 = vector.broadcast %15 : vector<1x512xbf16> to vector<32x512xbf16>
    %17 = arith.addf %14, %16 : vector<32x512xbf16>
    %cst_8 = arith.constant 0.000000e+00 : bf16
    %18 = vector.broadcast %cst_8 : bf16 to vector<32x512xbf16>
    %19 = arith.maximumf %17, %18 : vector<32x512xbf16>
    %c3 = arith.constant 3 : index
    %c0_9 = arith.constant 0 : index
    %20 = vector.load %arg2[%c3, %c0_9] : memref<8x512xf32, #tpu.memory_space<vmem>>, vector<1x256xf32>
    %c0_10 = arith.constant 0 : index
    %c0_11 = arith.constant 0 : index
    %21 = vector.load %arg4[%c0_10, %c0_11] : memref<512x256xbf16, #tpu.memory_space<vmem>>, vector<512x256xbf16>
    %cst_12 = arith.constant dense<0.000000e+00> : vector<32x256xf32>
    %22 = tpu.matmul %19, %21, %cst_12 {dimension_numbers = #tpu.dot_dimension_numbers<[1], [0], [0], [1], [0, 0, 1, 1], [], []>} : vector<32x512xbf16>, vector<512x256xbf16>, vector<32x256xf32> -> vector<32x256xf32>
    %23 = arith.truncf %22 : vector<32x256xf32> to vector<32x256xbf16>
    %24 = arith.truncf %20 : vector<1x256xf32> to vector<1x256xbf16>
    %25 = vector.broadcast %24 : vector<1x256xbf16> to vector<32x256xbf16>
    %26 = arith.addf %23, %25 : vector<32x256xbf16>
    %cst_13 = arith.constant 0.000000e+00 : bf16
    %27 = vector.broadcast %cst_13 : bf16 to vector<32x256xbf16>
    %28 = arith.maximumf %26, %27 : vector<32x256xbf16>
    %c4 = arith.constant 4 : index
    %c0_14 = arith.constant 0 : index
    %29 = vector.load %arg2[%c4, %c0_14] : memref<8x512xf32, #tpu.memory_space<vmem>>, vector<1x128xf32>
    %c0_15 = arith.constant 0 : index
    %c0_16 = arith.constant 0 : index
    %30 = vector.load %arg5[%c0_15, %c0_16] : memref<256x128xbf16, #tpu.memory_space<vmem>>, vector<256x128xbf16>
    %cst_17 = arith.constant dense<0.000000e+00> : vector<32x128xf32>
    %31 = tpu.matmul %28, %30, %cst_17 {dimension_numbers = #tpu.dot_dimension_numbers<[1], [0], [0], [1], [0, 0, 1, 1], [], []>} : vector<32x256xbf16>, vector<256x128xbf16>, vector<32x128xf32> -> vector<32x128xf32>
    %32 = arith.truncf %31 : vector<32x128xf32> to vector<32x128xbf16>
    %33 = arith.truncf %29 : vector<1x128xf32> to vector<1x128xbf16>
    %34 = vector.broadcast %33 : vector<1x128xbf16> to vector<32x128xbf16>
    %35 = arith.addf %32, %34 : vector<32x128xbf16>
    %cst_18 = arith.constant 0.000000e+00 : bf16
    %36 = vector.broadcast %cst_18 : bf16 to vector<32x128xbf16>
    %37 = arith.maximumf %35, %36 : vector<32x128xbf16>
    %c5 = arith.constant 5 : index
    %c0_19 = arith.constant 0 : index
    %38 = vector.load %arg2[%c5, %c0_19] : memref<8x512xf32, #tpu.memory_space<vmem>>, vector<1x64xf32>
    %c0_20 = arith.constant 0 : index
    %c0_21 = arith.constant 0 : index
    %39 = vector.load %arg6[%c0_20, %c0_21] : memref<128x64xbf16, #tpu.memory_space<vmem>>, vector<128x64xbf16>
    %cst_22 = arith.constant dense<0.000000e+00> : vector<32x64xf32>
    %40 = tpu.matmul %37, %39, %cst_22 {dimension_numbers = #tpu.dot_dimension_numbers<[1], [0], [0], [1], [0, 0, 1, 1], [], []>} : vector<32x128xbf16>, vector<128x64xbf16>, vector<32x64xf32> -> vector<32x64xf32>
    %41 = arith.truncf %40 : vector<32x64xf32> to vector<32x64xbf16>
    %42 = arith.truncf %38 : vector<1x64xf32> to vector<1x64xbf16>
    %43 = vector.broadcast %42 : vector<1x64xbf16> to vector<32x64xbf16>
    %44 = arith.addf %41, %43 : vector<32x64xbf16>
    %cst_23 = arith.constant 0.000000e+00 : bf16
    %45 = vector.broadcast %cst_23 : bf16 to vector<32x64xbf16>
    %46 = arith.maximumf %44, %45 : vector<32x64xbf16>
    %c6 = arith.constant 6 : index
    %c0_24 = arith.constant 0 : index
    %47 = vector.load %arg2[%c6, %c0_24] : memref<8x512xf32, #tpu.memory_space<vmem>>, vector<1x128xf32>
    %c0_25 = arith.constant 0 : index
    %c0_26 = arith.constant 0 : index
    %48 = vector.load %arg7[%c0_25, %c0_26] : memref<64x128xbf16, #tpu.memory_space<vmem>>, vector<64x128xbf16>
    %cst_27 = arith.constant dense<0.000000e+00> : vector<32x128xf32>
    %49 = tpu.matmul %46, %48, %cst_27 {dimension_numbers = #tpu.dot_dimension_numbers<[1], [0], [0], [1], [0, 0, 1, 1], [], []>} : vector<32x64xbf16>, vector<64x128xbf16>, vector<32x128xf32> -> vector<32x128xf32>
    %50 = vector.broadcast %47 : vector<1x128xf32> to vector<32x128xf32>
    %51 = arith.addf %49, %50 : vector<32x128xf32>
    %52 = arith.truncf %51 : vector<32x128xf32> to vector<32x128xbf16>
    %c0_28 = arith.constant 0 : index
    %c0_29 = arith.constant 0 : index
    %53 = vector.load %arg8[%c0_28, %c0_29] : memref<32x128xbf16, #tpu.memory_space<vmem>>, vector<32x128xbf16>
    tpu.vector_store %arg8[%c0_28, %c0_29], %52 {strides = array<i32>} : memref<32x128xbf16, #tpu.memory_space<vmem>>, vector<32x128xbf16>,
    return
  }
  func.func @transform_0(%arg0: i32) -> (i32, i32) {
    %c0_i32 = arith.constant 0 : i32
    %c0_i32_0 = arith.constant 0 : i32
    return %arg0, %c0_i32 : i32, i32
  }
  func.func @transform_1(%arg0: i32) -> (i32, i32) {
    %c0_i32 = arith.constant 0 : i32
    %c0_i32_0 = arith.constant 0 : i32
    %c0_i32_1 = arith.constant 0 : i32
    return %c0_i32, %c0_i32_0 : i32, i32
  }
  func.func @transform_2(%arg0: i32) -> (i32, i32) {
    %c0_i32 = arith.constant 0 : i32
    %c0_i32_0 = arith.constant 0 : i32
    %c0_i32_1 = arith.constant 0 : i32
    return %c0_i32, %c0_i32_0 : i32, i32
  }
  func.func @transform_3(%arg0: i32) -> (i32, i32) {
    %c0_i32 = arith.constant 0 : i32
    %c0_i32_0 = arith.constant 0 : i32
    %c0_i32_1 = arith.constant 0 : i32
    return %c0_i32, %c0_i32_0 : i32, i32
  }
  func.func @transform_4(%arg0: i32) -> (i32, i32) {
    %c0_i32 = arith.constant 0 : i32
    %c0_i32_0 = arith.constant 0 : i32
    %c0_i32_1 = arith.constant 0 : i32
    return %c0_i32, %c0_i32_0 : i32, i32
  }
  func.func @transform_5(%arg0: i32) -> (i32, i32) {
    %c0_i32 = arith.constant 0 : i32
    %c0_i32_0 = arith.constant 0 : i32
    %c0_i32_1 = arith.constant 0 : i32
    return %c0_i32, %c0_i32_0 : i32, i32
  }
  func.func @transform_6(%arg0: i32) -> (i32, i32) {
    %c0_i32 = arith.constant 0 : i32
    %c0_i32_0 = arith.constant 0 : i32
    %c0_i32_1 = arith.constant 0 : i32
    return %c0_i32, %c0_i32_0 : i32, i32
  }
  func.func @transform_7(%arg0: i32) -> (i32, i32) {
    %c0_i32 = arith.constant 0 : i32
    %c0_i32_0 = arith.constant 0 : i32
    return %arg0, %c0_i32 : i32, i32
  }
}

</mosaic_0001>

<bundles_post_ra>
// kernel: tpu_custom_call.1
= control target key start
LH: loop header
LB: loop body
LE: loop exit
PB: predicated region body
PF: predicated region fallthrough
CT: control target
= control target key end

     0   :  { %s3632_s0 = inlined_call_operand.vmem [shape: bf16[64,256], index: 0, kind: input, shape index: {}]   ;;  %s3633_s1 = inlined_call_operand.vmem [shape: f32[8,512], index: 1, kind: input, shape index: {}]   ;;  %s3634_s2 = inlined_call_operand.hbm [shape: bf16[256,512], index: 2, kind: input, shape index: {}]   ;;  %s3635_s3 = inlined_call_operand.hbm [shape: bf16[512,256], index: 3, kind: input, shape index: {}]   ;;  %s3636_s4 = inlined_call_operand.hbm [shape: bf16[256,128], index: 4, kind: input, shape index: {}]   ;;  %s3637_s5 = inlined_call_operand.vmem [shape: bf16[128,64], index: 5, kind: input, shape index: {}]   ;;  %s3638_s6 = inlined_call_operand.hbm [shape: bf16[64,128], index: 6, kind: input, shape index: {}]   ;;  %s3639_s7 = inlined_call_operand.hbm [shape: bf16[64,128], index: 7, kind: output, shape index: {}]  }
   0x1   :  { %3641 = sst [smem:[#allocation17_spill]] %s3634_s2 }
   0x2   :  { %3642 = sst [smem:[#allocation18_spill]] %s3635_s3 }
   0x3   :  { %12 = vsyncpa [#allocation3], 0 }
   0x4   :  { %13 = vsyncpa [#allocation6], 0 }
   0x5   :  { %14 = vsyncpa [#allocation9], 0 }
   0x6   :  { %15 = vsyncpa [#allocation4], 0 }
   0x7   :  { %17 = vsyncpa [#allocation4 + $0x1], 0  ;;  %s3322_s24 = smov 0   ;;  %s3324_s25 = smov 0  }
   0x8   :  { %s3326_s26 = smov 0   ;;  %s3328_s27 = smov 0  }
   0x9 LB: > { %3643 = sst [smem:[#allocation15_spill]] %s3264_s26  ;;  %s3343_s28 = sadd.s32 4294967295, %s3268_s27   ;;  %s3268_s27 = sphi %s3328_s27, %s3657_s27   ;;  %s3264_s26 = sphi %s3326_s26, %s3656_s26   ;;  %s3260_s25 = sphi %s3324_s25, %s3655_s25   ;;  %s3256_s24 = sphi %s3322_s24, %s3654_s24  }
   0xa   : > { %s2167_s29 = sadd.s32 4294967294, %s3268_s27   ;;  %s3347_s30 = sadd.s32 1, %s3268_s27  }
   0xb   : > { %s182_s8 = sadd.s32 1, %s3264_s26  ;;  %s179_s9 = ssub.s32 %s3268_s27, %s3347_s30 }
   0xc   : > { %p192_p0 = scmp.ne.s32.totalorder %s3264_s26, %s3260_s25  ;;  %p180_p1 = scmp.eq.s32.totalorder %s179_s9, 0 }
   0xd   : > { %p193_p2 = scmp.eq.s32.totalorder %s3343_s28, 1  ;;  %p198_p3 = scmp.ne.s32.totalorder %s3260_s25, %s3256_s24 }
   0xe   : > { %p199_p4 = scmp.eq.s32.totalorder %s2167_s29, 1  ;;  %p2168_p7 = scmp.ge.s32.totalorder %s3268_s27, 1 }
   0xf   : > { %s3358_s10 = scalar_select %p180_p1, %s3264_s26, %s182_s8  }
  0x10   : > { %p3360_p5 = por %p193_p2, %p192_p0  ;;  %p3364_p6 = por %p199_p4, %p198_p3 }
  0x11   : > { %3644 = sst [smem:[#allocation16_spill]] %s3358_s10  ;;  %p206_p8 = scmp.lt.s32.totalorder %s3268_s27, 3 }
  0x12   : > { %p3021_p9 = scmp.eq.s32.totalorder %s3343_s28, 0  ;;  %s3648_s3 = sld [smem:[#allocation18_spill]] }
  0x13   : > { %p3371_p10 = pnand %p2168_p7, %p206_p8  ;;  %s3270_s17 = smov [#allocation5]  }
  0x14   : > { %s236_s18 = sshll.u32 %s3270_s17, 4  ;;  %s3650_s2 = sld [smem:[#allocation17_spill]]  ;;  %s237_s18 = int_to_ptr.vmem [resolvable:$true] %s236_s18 }
  0x15   : > { %p3004_p11 = pneg %p3371_p10  ;;  %s3271_s23 = smov 128  }
  0x16   : > { %s3272_s29 = smov 8   ;;  %s3273_s8 = smov [#allocation2]  }
  0x17   : > { %p3382_p12 = pnand %p3021_p9, %p3004_p11  ;;  %s222_s9 = sshll.u32 %s3273_s8, 4  ;;  %s223_s9 = int_to_ptr.vmem [resolvable:$true] %s222_s9 }
  0x18   : > { %s234_s16 = sshll.u32 %s3648_s3, 4  ;;  %s3274_s14 = smov 256   ;;  %s235_s16 = int_to_ptr.hbm [resolvable:$true] %s234_s16 }
  0x19   : > { %3010 = dma.hbm_to_vmem [thread:$0]  (!%p3382_p12), %s235_s16, 8192, %s237_s18, [#allocation6], %s3271_s23, %s3271_s23, %s3272_s29  }
  0x1a   : > { %s220_s22 = sshll.u32 %s3650_s2, 4  ;;  %s3275_s15 = smov 16   ;;  %s221_s22 = int_to_ptr.hbm [resolvable:$true] %s220_s22 }
  0x1b   : > { %3007 = dma.hbm_to_vmem [thread:$0]  (!%p3382_p12), %s221_s22, 8192, %s223_s9, [#allocation3], %s3274_s14, %s3274_s14, %s3275_s15  }
  0x1c   : > { %s248_s20 = sshll.u32 %s3636_s4, 4  ;;  %s3276_s21 = smov [#allocation7]   ;;  %s249_s20 = int_to_ptr.hbm [resolvable:$true] %s248_s20 }
  0x1d   : > { %s250_s2 = sshll.u32 %s3276_s21, 4  ;;  %s265_s16 = sshll.u32 %s3638_s6, 4  ;;  %s251_s2 = int_to_ptr.vmem [resolvable:$true] %s250_s2  ;;  %s266_s16 = int_to_ptr.hbm [resolvable:$true] %s265_s16 }
  0x1e   : > { %s3277_s18 = smov 64   ;;  %s3278_s23 = smov 4  }
  0x1f   : > { %3013 = dma.hbm_to_vmem [thread:$0]  (!%p3382_p12), %s249_s20, 2048, %s251_s2, [#allocation6], %s3277_s18, %s3277_s18, %s3278_s23  }
  0x20   : > { %s3279_s29 = smov [#allocation8]   ;;  %293 = sbr.rel (%p3371_p10) target bundleno = 909 (0x38d), region = 48 }
  0x21   : > { %s267_s8 = sshll.u32 %s3279_s29, 4  ;;  %s268_s8 = int_to_ptr.vmem [resolvable:$true] %s267_s8 }
  0x22   : > { %3016 = dma.hbm_to_vmem [thread:$0]  (!%p3382_p12), %s266_s16, 512, %s268_s8, [#allocation9], %s3277_s18, %s3277_s18, %s3278_s23  }
  0x25   : > { %3239 = dma.done.wait (%p3021_p9), [#allocation3], 8192  }
  0x26   : > { %3241 = vsyncadd (%p3021_p9), [#allocation3], 4294959104 }
  0x27   : > { %3243 = dma.done.wait (%p3021_p9), [#allocation6], 10240  }
  0x28   : > { %3245 = vsyncadd (%p3021_p9), [#allocation6], 4294957056 }
  0x29   : > { %3247 = dma.done.wait (%p3021_p9), [#allocation9], 512  }
  0x2a   : > { %3249 = vsyncadd (%p3021_p9), [#allocation9], 4294966784  ;;  %s2180_s2 = sshll.u32 %s3343_s28, 2  ;;  %v2299_v0 = vld [vmem:[#allocation2 + $0xe0] sm:$0xf]  ;;  %vm2014_vm0 = vcmask 523264  }
  0x2b   : > { %p3420_p13 = scmp.lt.s32.totalorder %s2180_s2, 7  ;;  %v2848_v1 = vld [vmem:[#allocation2 + $0xec] sm:$0xf0]  ;;  %v2427_v2 = vld [vmem:[#allocation2 + $0x1e0] sm:$0xf]  ;;  %s339_s29 = sand.u32 1, %s3260_s25  }
  0x2c   : > { %v2300_v3 = vor.u32 %v2848_v1, %v2299_v0  ;;  %v2880_v4 = vld [vmem:[#allocation2 + $0x1ec] sm:$0xf0]  ;;  %v2846_v5 = vld [vmem:[#allocation2 + $0xe4] sm:$0xf]  ;;  %v2301_v6 = vld [vmem:[#allocation2 + $0xf0] sm:$0xf0] }
  0x2d   : > { %v2428_v7 = vor.u32 %v2880_v4, %v2427_v2  ;;  %v2304_v8 = vor.u32 %v2846_v5, %v2301_v6  ;;  %v2878_v9 = vld [vmem:[#allocation2 + $0x1e4] sm:$0xf]  ;;  %v2429_v10 = vld [vmem:[#allocation2 + $0x1f0] sm:$0xf0]  ;;  %v2283_v11 = vld [vmem:[#allocation2 + $0xc0] sm:$0xf] }
  0x2e   : > { %790 = vmatpush.bf16.msra.mxu0 %v2300_v3  ;;  %v2432_v12 = vor.u32 %v2878_v9, %v2429_v10  ;;  %v2844_v13 = vld [vmem:[#allocation2 + $0xcc] sm:$0xf0]  ;;  %v2411_v14 = vld [vmem:[#allocation2 + $0x1c0] sm:$0xf]  ;;  %v2842_v18 = vld [vmem:[#allocation2 + $0xc4] sm:$0xf] }
  0x2f   : > { %v2876_v15 = vld [vmem:[#allocation2 + $0x1cc] sm:$0xf0]  ;;  %809 = vmatpush.bf16.msra.mxu1 %v2428_v7  ;;  %828 = vmatpush.bf16.msra.mxu2 %v2304_v8  ;;  %v2284_v16 = vor.u32 %v2844_v13, %v2283_v11  ;;  %v2285_v19 = vld [vmem:[#allocation2 + $0xd0] sm:$0xf0]  ;;  %v2874_v20 = vld [vmem:[#allocation2 + $0x1c4] sm:$0xf] }
  0x30   : > { %v2412_v17 = vor.u32 %v2876_v15, %v2411_v14  ;;  %847 = vmatpush.bf16.msra.mxu3 %v2432_v12  ;;  %v2288_v21 = vor.u32 %v2842_v18, %v2285_v19  ;;  %v2413_v22 = vld [vmem:[#allocation2 + $0x1d0] sm:$0xf0]  ;;  %v2267_v23 = vld [vmem:[#allocation2 + $0xa0] sm:$0xf]  ;;  %v2840_v24 = vld [vmem:[#allocation2 + $0xac] sm:$0xf0] }
  0x31   : > { %v2416_v25 = vor.u32 %v2874_v20, %v2413_v22  ;;  %v2395_v26 = vld [vmem:[#allocation2 + $0x1a0] sm:$0xf]  ;;  %v2872_v27 = vld [vmem:[#allocation2 + $0x1ac] sm:$0xf0]  ;;  %v2838_v28 = vld [vmem:[#allocation2 + $0xa4] sm:$0xf]  ;;  %v2268_v29 = vor.u32 %v2840_v24, %v2267_v23 }
  0x32   : > { %791 = vmatpush.bf16.msra.mxu0 %v2284_v16  ;;  %v2269_v30 = vld [vmem:[#allocation2 + $0xb0] sm:$0xf0]  ;;  %v2870_v31 = vld [vmem:[#allocation2 + $0x1a4] sm:$0xf]  ;;  %v2396_v33 = vor.u32 %v2872_v27, %v2395_v26  ;;  %v2251_v35 = vld [vmem:[#allocation2 + $0x80] sm:$0xf] }
  0x33   : > { %v2397_v32 = vld [vmem:[#allocation2 + $0x1b0] sm:$0xf0]  ;;  %810 = vmatpush.bf16.msra.mxu1 %v2412_v17  ;;  %829 = vmatpush.bf16.msra.mxu2 %v2288_v21  ;;  %v2272_v34 = vor.u32 %v2838_v28, %v2269_v30  ;;  %v2836_v36 = vld [vmem:[#allocation2 + $0x8c] sm:$0xf0]  ;;  %v2379_v37 = vld [vmem:[#allocation2 + $0x180] sm:$0xf] }
  0x34   : > { %848 = vmatpush.bf16.msra.mxu3 %v2416_v25  ;;  %v2400_v38 = vor.u32 %v2870_v31, %v2397_v32  ;;  %v2868_v39 = vld [vmem:[#allocation2 + $0x18c] sm:$0xf0]  ;;  %v2834_v40 = vld [vmem:[#allocation2 + $0x84] sm:$0xf]  ;;  %v2253_v41 = vld [vmem:[#allocation2 + $0x90] sm:$0xf0]  ;;  %v2252_v44 = vor.u32 %v2836_v36, %v2251_v35 }
  0x35   : > { %v2866_v42 = vld [vmem:[#allocation2 + $0x184] sm:$0xf]  ;;  %v2381_v43 = vld [vmem:[#allocation2 + $0x190] sm:$0xf0]  ;;  %s3659_s2 = smov (!%p3420_p13, %s2180_s2), 7  ;;  %v2380_v45 = vor.u32 %v2868_v39, %v2379_v37  ;;  %v2256_v46 = vor.u32 %v2834_v40, %v2253_v41  ;;  %s2179_s3 = sshll.u32 %s339_s29, 4 }
  0x36   : > { %792 = vmatpush.bf16.msra.mxu0 %v2268_v29  ;;  %v2235_v47 = vld [vmem:[#allocation2 + $0x60] sm:$0xf]  ;;  %v2832_v48 = vld [vmem:[#allocation2 + $0x6c] sm:$0xf0]  ;;  %v2384_v50 = vor.u32 %v2866_v42, %v2381_v43  ;;  %v2830_v52 = vld [vmem:[#allocation2 + $0x64] sm:$0xf] }
  0x37   : > { %811 = vmatpush.bf16.msra.mxu1 %v2396_v33  ;;  %830 = vmatpush.bf16.msra.mxu2 %v2272_v34  ;;  %v2363_v49 = vld [vmem:[#allocation2 + $0x160] sm:$0xf]  ;;  %v2864_v51 = vld [vmem:[#allocation2 + $0x16c] sm:$0xf0]  ;;  %v2237_v53 = vld [vmem:[#allocation2 + $0x70] sm:$0xf0]  ;;  %v2236_v56 = vor.u32 %v2832_v48, %v2235_v47 }
  0x38   : > { %849 = vmatpush.bf16.msra.mxu3 %v2400_v38  ;;  %v2862_v54 = vld [vmem:[#allocation2 + $0x164] sm:$0xf]  ;;  %v2365_v55 = vld [vmem:[#allocation2 + $0x170] sm:$0xf0]  ;;  %s2817_s26 = sshll.u32 %s3659_s2, 3  ;;  %v2364_v57 = vor.u32 %v2864_v51, %v2363_v49  ;;  %v2240_v58 = vor.u32 %v2830_v52, %v2237_v53  ;;  %s2974_s10 = sshll.u32 %s3343_s28, 4 }
  0x39   : > { %v2219_v59 = vld [vmem:[#allocation2 + $0x40] sm:$0xf]  ;;  %v2828_v60 = vld [vmem:[#allocation2 + $0x4c] sm:$0xf0]  ;;  %v2368_v62 = vor.u32 %v2862_v54, %v2365_v55  ;;  %v2826_v0 = vld [vmem:[#allocation2 + $0x44] sm:$0xf]  ;;  %s3434_s19 = scalar_lea.vmem %s3632_s0, %s2817_s26  ;;  %s2060_s22 = scalar_lea.hbm %s3639_s7, %s2974_s10 }
  0x3a   : > { %793 = vmatpush.bf16.msra.mxu0 %v2252_v44  ;;  %v2347_v61 = vld [vmem:[#allocation2 + $0x140] sm:$0xf]  ;;  %v2860_v63 = vld [vmem:[#allocation2 + $0x14c] sm:$0xf0]  ;;  %v2221_v1 = vld [vmem:[#allocation2 + $0x50] sm:$0xf0]  ;;  %v2220_v5 = vor.u32 %v2828_v60, %v2219_v59 }
  0x3b   : > { %812 = vmatpush.bf16.msra.mxu1 %v2380_v45  ;;  %831 = vmatpush.bf16.msra.mxu2 %v2256_v46  ;;  %v2858_v2 = vld [vmem:[#allocation2 + $0x144] sm:$0xf]  ;;  %v2349_v3 = vld [vmem:[#allocation2 + $0x150] sm:$0xf0]  ;;  %v2203_v4 = vld [vmem:[#allocation2 + $0x20] sm:$0xf]  ;;  %v2348_v9 = vor.u32 %v2860_v63, %v2347_v61  ;;  %v2224_v10 = vor.u32 %v2826_v0, %v2221_v1 }
  0x3c   : > { %850 = vmatpush.bf16.msra.mxu3 %v2384_v50  ;;  %v2824_v6 = vld [vmem:[#allocation2 + $0x2c] sm:$0xf0]  ;;  %v2331_v7 = vld [vmem:[#allocation2 + $0x120] sm:$0xf]  ;;  %v2822_v11 = vld [vmem:[#allocation2 + $0x24] sm:$0xf]  ;;  %v2352_v14 = vor.u32 %v2858_v2, %v2349_v3 }
  0x3d   : > { %v2856_v8 = vld [vmem:[#allocation2 + $0x12c] sm:$0xf0]  ;;  %v2205_v12 = vld [vmem:[#allocation2 + $0x30] sm:$0xf0]  ;;  %v2854_v13 = vld [vmem:[#allocation2 + $0x124] sm:$0xf]  ;;  %v2204_v18 = vor.u32 %v2824_v6, %v2203_v4 }
  0x3e   : > { %794 = vmatpush.bf16.msra.mxu0 %v2236_v56  ;;  %v2333_v15 = vld [vmem:[#allocation2 + $0x130] sm:$0xf0]  ;;  %v351_v16 = vld [vmem:[%s3633_s1] ss:$8 sm:$0x3]  ;;  %v2332_v31 = vor.u32 %v2856_v8, %v2331_v7  ;;  %v2208_v32 = vor.u32 %v2822_v11, %v2205_v12  ;;  %v357_v54 = vld [vmem:[%s3434_s19 + $0x18] sm:$0xff] }
  0x3f   : > { %813 = vmatpush.bf16.msra.mxu1 %v2364_v57  ;;  %832 = vmatpush.bf16.msra.mxu2 %v2240_v58  ;;  %v354_v17 = vld [vmem:[%s3434_s19] sm:$0xff]  ;;  %v355_v21 = vld [vmem:[%s3434_s19 + $0x8] sm:$0xff]  ;;  %v3444_v23 = vperm.slane %v351_v16, 0  ;;  %v2820_v25 = vld [vmem:[#allocation2 + $0xc] sm:$0xf0]  ;;  %v3448_v30 = vperm.slane %v351_v16, 1  ;;  %v2336_v37 = vor.u32 %v2854_v13, %v2333_v15  ;;  %v364_v7 = vunpack.c.l.bf16 %v357_v54 }
  0x40   : > { %851 = vmatpush.bf16.msra.mxu3 %v2368_v62  ;;  %v2187_v19 = vld [vmem:[#allocation2] sm:$0xf]  ;;  %v358_v22 = vunpack.c.l.bf16 %v354_v17  ;;  %v359_v24 = vunpack.c.h.bf16 %v354_v17  ;;  %v360_v27 = vunpack.c.l.bf16 %v355_v21  ;;  %v361_v29 = vunpack.c.h.bf16 %v355_v21  ;;  %v2852_v33 = vld [vmem:[#allocation2 + $0x10c] sm:$0xf0]  ;;  %v2818_v34 = vld [vmem:[#allocation2 + $0x4] sm:$0xf] }
  0x41   : > { %v2183_v20 = vld [vmem:[%s3633_s1 + $0x1] ss:$8 sm:$0x3]  ;;  %v2189_v38 = vld [vmem:[#allocation2 + $0x10] sm:$0xf0]  ;;  %v2188_v48 = vor.u32 %v2820_v25, %v2187_v19  ;;  %v365_v13 = vunpack.c.h.bf16 %v357_v54  ;;  %s341_s26 = scalar_lea.vmem [#allocation10], %s2179_s3 }
  0x42   : > { %795 = vmatpush.bf16.msra.mxu0 %v2220_v5  ;;  %v2315_v26 = vld [vmem:[#allocation2 + $0x100] sm:$0xf]  ;;  %v3446_v28 = vperm.slane %v2183_v20, 0  ;;  %v371_v35 = vmul.f32 %v3444_v23, %v358_v22  ;;  %v3451_v36 = vperm.slane %v2183_v20, 1  ;;  %v2850_v39 = vld [vmem:[#allocation2 + $0x104] sm:$0xf]  ;;  %v373_v41 = vmul.f32 %v3444_v23, %v360_v27 }
  0x43   : > { %814 = vmatpush.bf16.msra.mxu1 %v2348_v9  ;;  %833 = vmatpush.bf16.msra.mxu2 %v2224_v10  ;;  %v2317_v40 = vld [vmem:[#allocation2 + $0x110] sm:$0xf0]  ;;  %v372_v42 = vmul.f32 %v3448_v30, %v359_v24  ;;  %v374_v43 = vmul.f32 %v3448_v30, %v361_v29  ;;  %v2847_v45 = vld [vmem:[#allocation2 + $0xec] sm:$0xf]  ;;  %v2309_v46 = vld [vmem:[#allocation2 + $0xf8] sm:$0xf0]  ;;  %v2316_v55 = vor.u32 %v2852_v33, %v2315_v26 }
  0x44   : > { %852 = vmatpush.bf16.msra.mxu3 %v2352_v14  ;;  %v384_v44 = vadd.f32 %v3446_v28, %v371_v35  ;;  %v356_v47 = vld [vmem:[%s3434_s19 + $0x10] sm:$0xff]  ;;  %v386_v49 = vadd.f32 %v3446_v28, %v373_v41  ;;  %v2879_v52 = vld [vmem:[#allocation2 + $0x1ec] sm:$0xf]  ;;  %v2437_v53 = vld [vmem:[#allocation2 + $0x1f8] sm:$0xf0]  ;;  %v2192_v56 = vor.u32 %v2818_v34, %v2189_v38  ;;  %v2320_v57 = vor.u32 %v2850_v39, %v2317_v40  ;;  %s2061_s9 = sshll.u32 %s341_s26, 4  ;;  %s2062_s9 = int_to_ptr.vmem [resolvable:$true] %s2061_s9 }
  0x45   : > { %v385_v50 = vadd.f32 %v3451_v36, %v372_v42  ;;  %v387_v51 = vadd.f32 %v3451_v36, %v374_v43  ;;  %v2307_v59 = vld [vmem:[#allocation2 + $0xe8] sm:$0xf]  ;;  %v2849_v60 = vld [vmem:[#allocation2 + $0xf4] sm:$0xf0]  ;;  %v2312_v0 = vor.u32 %v2847_v45, %v2309_v46  ;;  %v2440_v2 = vor.u32 %v2879_v52, %v2437_v53  ;;  %v2843_v4 = vld [vmem:[#allocation2 + $0xcc] sm:$0xf] }
  0x46   : > { %796 = vmatpush.bf16.msra.mxu0 %v2204_v18  ;;  %v392_v58 = vmax.f32 %v384_v44, 0.0  ;;  %v394_v61 = vmax.f32 %v386_v49, 0.0  ;;  %v2435_v1 = vld [vmem:[#allocation2 + $0x1e8] sm:$0xf]  ;;  %v2881_v3 = vld [vmem:[#allocation2 + $0x1f4] sm:$0xf0]  ;;  %v362_v6 = vunpack.c.l.bf16 %v356_v47  ;;  %v363_v12 = vunpack.c.h.bf16 %v356_v47 }
  0x47   : > { %815 = vmatpush.bf16.msra.mxu1 %v2332_v31  ;;  %834 = vmatpush.bf16.msra.mxu2 %v2208_v32  ;;  %v393_v62 = vmax.f32 %v385_v50, 0.0  ;;  %v395_v63 = vmax.f32 %v387_v51, 0.0  ;;  %v2293_v5 = vld [vmem:[#allocation2 + $0xd8] sm:$0xf0]  ;;  %v2875_v10 = vld [vmem:[#allocation2 + $0x1cc] sm:$0xf]  ;;  %v2308_v14 = vor.u32 %v2849_v60, %v2307_v59  ;;  %v2436_v15 = vor.u32 %v2881_v3, %v2435_v1 }
  0x48   : > { %853 = vmatpush.bf16.msra.mxu3 %v2336_v37  ;;  %v3462_v8 = vpack.c.bf16 %v394_v61, %v392_v58  ;;  %v2421_v11 = vld [vmem:[#allocation2 + $0x1d8] sm:$0xf0]  ;;  %v2296_v16 = vor.u32 %v2843_v4, %v2293_v5  ;;  %v2291_v17 = vld [vmem:[#allocation2 + $0xc8] sm:$0xf]  ;;  %v2845_v18 = vld [vmem:[#allocation2 + $0xd4] sm:$0xf0]  ;;  %v375_v25 = vmul.f32 %v3444_v23, %v362_v6  ;;  %v377_v26 = vmul.f32 %v3444_v23, %v364_v7 }
  0x49   : > { %v3464_v9 = vpack.c.bf16 %v395_v63, %v393_v62  ;;  %v2419_v19 = vld [vmem:[#allocation2 + $0x1c8] sm:$0xf]  ;;  %v2424_v20 = vor.u32 %v2875_v10, %v2421_v11  ;;  %v2877_v21 = vld [vmem:[#allocation2 + $0x1d4] sm:$0xf0]  ;;  %v2839_v22 = vld [vmem:[#allocation2 + $0xac] sm:$0xf]  ;;  %v376_v31 = vmul.f32 %v3448_v30, %v363_v12  ;;  %v378_v32 = vmul.f32 %v3448_v30, %v365_v13 }
  0x4a   : > { %797 = vmatpush.bf16.msra.mxu0 %v2188_v48  ;;  %v2277_v24 = vld [vmem:[#allocation2 + $0xb8] sm:$0xf0]  ;;  %v2871_v27 = vld [vmem:[#allocation2 + $0x1ac] sm:$0xf]  ;;  %v2292_v33 = vor.u32 %v2845_v18, %v2291_v17  ;;  %v2420_v34 = vor.u32 %v2877_v21, %v2419_v19  ;;  %v2275_v37 = vld [vmem:[#allocation2 + $0xa8] sm:$0xf]  ;;  %v388_v43 = vadd.f32 %v3446_v28, %v375_v25  ;;  %v390_v30 = vadd.f32 %v3446_v28, %v377_v26 }
  0x4b   : > { %816 = vmatpush.bf16.msra.mxu1 %v2316_v55  ;;  %835 = vmatpush.bf16.msra.mxu2 %v2192_v56  ;;  %v2405_v29 = vld [vmem:[#allocation2 + $0x1b8] sm:$0xf0]  ;;  %v2280_v35 = vor.u32 %v2839_v22, %v2277_v24  ;;  %v2841_v23 = vld [vmem:[#allocation2 + $0xb4] sm:$0xf0]  ;;  %v2403_v38 = vld [vmem:[#allocation2 + $0x1a8] sm:$0xf]  ;;  %v389_v46 = vadd.f32 %v3451_v36, %v376_v31  ;;  %v391_v47 = vadd.f32 %v3451_v36, %v378_v32 }
  0x4c   : > { %854 = vmatpush.bf16.msra.mxu3 %v2320_v57  ;;  %v2408_v39 = vor.u32 %v2871_v27, %v2405_v29  ;;  %v2873_v40 = vld [vmem:[#allocation2 + $0x1b4] sm:$0xf0]  ;;  %v2835_v41 = vld [vmem:[#allocation2 + $0x8c] sm:$0xf]  ;;  %v2261_v42 = vld [vmem:[#allocation2 + $0x98] sm:$0xf0]  ;;  %v2276_v48 = vor.u32 %v2841_v23, %v2275_v37 }
  0x4d   : > { %798 = vmatmul.bf16.vlgmr.msra.gmra.mxu0 %v3462_v8  ;;  %v2867_v44 = vld [vmem:[#allocation2 + $0x18c] sm:$0xf]  ;;  %v2389_v45 = vld [vmem:[#allocation2 + $0x198] sm:$0xf0]  ;;  %v2259_v49 = vld [vmem:[#allocation2 + $0x88] sm:$0xf]  ;;  %v2404_v50 = vor.u32 %v2873_v40, %v2403_v38  ;;  %v2264_v51 = vor.u32 %v2835_v41, %v2261_v42 }
  0x4e   : > { %817 = vmatmul.bf16.vlgmr.msra.gmra.mxu1 %v3464_v9  ;;  %836 = vmatmul.bf16.vlgmr.msra.gmra.mxu2 %v3462_v8  ;;  %v2837_v52 = vld [vmem:[#allocation2 + $0x94] sm:$0xf0]  ;;  %v2387_v53 = vld [vmem:[#allocation2 + $0x188] sm:$0xf]  ;;  %v2392_v55 = vor.u32 %v2867_v44, %v2389_v45  ;;  %v396_v56 = vmax.f32 %v388_v43, 0.0  ;;  %v398_v28 = vmax.f32 %v390_v30, 0.0 }
  0x4f   : > { %904 = vmatpush.bf16.msrb.mxu2 %v2312_v0  ;;  %855 = vmatmul.bf16.vlgmr.msra.gmra.mxu3 %v3464_v9  ;;  %v2869_v54 = vld [vmem:[#allocation2 + $0x194] sm:$0xf0]  ;;  %v2831_v57 = vld [vmem:[#allocation2 + $0x6c] sm:$0xf]  ;;  %v2245_v58 = vld [vmem:[#allocation2 + $0x78] sm:$0xf0]  ;;  %v2260_v62 = vor.u32 %v2837_v52, %v2259_v49 }
  0x50   : > { %923 = vmatpush.bf16.msrb.mxu3 %v2440_v2  ;;  %866 = vmatpush.bf16.msrb.mxu0 %v2308_v14  ;;  %v397_v59 = vmax.f32 %v389_v46, 0.0  ;;  %v399_v60 = vmax.f32 %v391_v47, 0.0  ;;  %v2863_v61 = vld [vmem:[#allocation2 + $0x16c] sm:$0xf]  ;;  %v2373_v36 = vld [vmem:[#allocation2 + $0x178] sm:$0xf0]  ;;  %v2388_v63 = vor.u32 %v2869_v54, %v2387_v53  ;;  %v2248_v0 = vor.u32 %v2831_v57, %v2245_v58 }
  0x51   : > { %885 = vmatpush.bf16.msrb.mxu1 %v2436_v15  ;;  %v2243_v1 = vld [vmem:[#allocation2 + $0x68] sm:$0xf]  ;;  %v2833_v2 = vld [vmem:[#allocation2 + $0x74] sm:$0xf0]  ;;  %v3478_v4 = vpack.c.bf16 %v398_v28, %v396_v56  ;;  %v2376_v5 = vor.u32 %v2863_v61, %v2373_v36  ;;  %v2827_v7 = vld [vmem:[#allocation2 + $0x4c] sm:$0xf] }
  0x52   : > { %v2371_v3 = vld [vmem:[#allocation2 + $0x168] sm:$0xf]  ;;  %v2865_v6 = vld [vmem:[#allocation2 + $0x174] sm:$0xf0]  ;;  %v2229_v10 = vld [vmem:[#allocation2 + $0x58] sm:$0xf0]  ;;  %v3480_v11 = vpack.c.bf16 %v399_v60, %v397_v59  ;;  %v2244_v14 = vor.u32 %v2833_v2, %v2243_v1 }
  0x53   : > { %905 = vmatpush.bf16.msrb.mxu2 %v2296_v16  ;;  %v2859_v12 = vld [vmem:[#allocation2 + $0x14c] sm:$0xf]  ;;  %v2357_v13 = vld [vmem:[#allocation2 + $0x158] sm:$0xf0]  ;;  %v2372_v15 = vor.u32 %v2865_v6, %v2371_v3  ;;  %v2232_v16 = vor.u32 %v2827_v7, %v2229_v10  ;;  %v2227_v17 = vld [vmem:[#allocation2 + $0x48] sm:$0xf] }
  0x54   : > { %924 = vmatpush.bf16.msrb.mxu3 %v2424_v20  ;;  %867 = vmatpush.bf16.msrb.mxu0 %v2292_v33  ;;  %v2829_v18 = vld [vmem:[#allocation2 + $0x54] sm:$0xf0]  ;;  %v2355_v19 = vld [vmem:[#allocation2 + $0x148] sm:$0xf]  ;;  %v2360_v20 = vor.u32 %v2859_v12, %v2357_v13  ;;  %v2823_v22 = vld [vmem:[#allocation2 + $0x2c] sm:$0xf] }
  0x55   : > { %886 = vmatpush.bf16.msrb.mxu1 %v2420_v34  ;;  %v2861_v21 = vld [vmem:[#allocation2 + $0x154] sm:$0xf0]  ;;  %v2213_v24 = vld [vmem:[#allocation2 + $0x38] sm:$0xf0]  ;;  %v2855_v25 = vld [vmem:[#allocation2 + $0x12c] sm:$0xf]  ;;  %v2228_v27 = vor.u32 %v2829_v18, %v2227_v17 }
  0x56   : > { %v2341_v26 = vld [vmem:[#allocation2 + $0x138] sm:$0xf0]  ;;  %v2356_v29 = vor.u32 %v2861_v21, %v2355_v19  ;;  %v2216_v31 = vor.u32 %v2823_v22, %v2213_v24  ;;  %v2211_v32 = vld [vmem:[#allocation2 + $0x28] sm:$0xf]  ;;  %v2825_v33 = vld [vmem:[#allocation2 + $0x34] sm:$0xf0] }
  0x57   : > { %906 = vmatpush.bf16.msrb.mxu2 %v2280_v35  ;;  %v2339_v34 = vld [vmem:[#allocation2 + $0x128] sm:$0xf]  ;;  %v2344_v35 = vor.u32 %v2855_v25, %v2341_v26  ;;  %v2857_v37 = vld [vmem:[#allocation2 + $0x134] sm:$0xf0]  ;;  %v2819_v23 = vld [vmem:[#allocation2 + $0xc] sm:$0xf]  ;;  %v2212_v41 = vor.u32 %v2825_v33, %v2211_v32 }
  0x58   : > { %925 = vmatpush.bf16.msrb.mxu3 %v2408_v39  ;;  %868 = vmatpush.bf16.msrb.mxu0 %v2276_v48  ;;  %v2197_v38 = vld [vmem:[#allocation2 + $0x18] sm:$0xf0]  ;;  %v2851_v39 = vld [vmem:[#allocation2 + $0x10c] sm:$0xf]  ;;  %v2340_v42 = vor.u32 %v2857_v37, %v2339_v34  ;;  %v2195_v30 = vld [vmem:[#allocation2 + $0x8] sm:$0xf] }
  0x59   : > { %887 = vmatpush.bf16.msrb.mxu1 %v2404_v50  ;;  %v2325_v40 = vld [vmem:[#allocation2 + $0x118] sm:$0xf0]  ;;  %v2200_v43 = vor.u32 %v2819_v23, %v2197_v38  ;;  %v2821_v44 = vld [vmem:[#allocation2 + $0x14] sm:$0xf0]  ;;  %v2323_v45 = vld [vmem:[#allocation2 + $0x108] sm:$0xf] }
  0x5a   : > { %v2328_v46 = vor.u32 %v2851_v39, %v2325_v40  ;;  %v2853_v47 = vld [vmem:[#allocation2 + $0x114] sm:$0xf0]  ;;  %v2500_v48 = vld [vmem:[#allocation5 + $0x70] sm:$0xf]  ;;  %v2196_v52 = vor.u32 %v2821_v44, %v2195_v30  ;;  %v2492_v56 = vld [vmem:[#allocation5 + $0x60] sm:$0xf] }
  0x5b   : > { %907 = vmatpush.bf16.msrb.mxu2 %v2264_v51  ;;  %v2897_v49 = vld [vmem:[#allocation5 + $0x74] sm:$0xf0]  ;;  %v2564_v50 = vld [vmem:[#allocation5 + $0xf0] sm:$0xf]  ;;  %v2324_v53 = vor.u32 %v2853_v47, %v2323_v45  ;;  %v2895_v28 = vld [vmem:[#allocation5 + $0x64] sm:$0xf0] }
  0x5c   : > { %926 = vmatpush.bf16.msrb.mxu3 %v2392_v55  ;;  %869 = vmatpush.bf16.msrb.mxu0 %v2260_v62  ;;  %v2913_v51 = vld [vmem:[#allocation5 + $0xf4] sm:$0xf0]  ;;  %v2501_v54 = vor.u32 %v2897_v49, %v2500_v48  ;;  %v2556_v57 = vld [vmem:[#allocation5 + $0xe0] sm:$0xf]  ;;  %v2493_v58 = vor.u32 %v2895_v28, %v2492_v56  ;;  %v2911_v59 = vld [vmem:[#allocation5 + $0xe4] sm:$0xf0] }
  0x5d   : > { %888 = vmatpush.bf16.msrb.mxu1 %v2388_v63  ;;  %803 = vmatmul.bf16.gmra.mxu0 %v3478_v4  ;;  %v2565_v55 = vor.u32 %v2913_v51, %v2564_v50  ;;  %v2557_v60 = vor.u32 %v2911_v59, %v2556_v57  ;;  %v2893_v61 = vld [vmem:[#allocation5 + $0x54] sm:$0xf0]  ;;  %v2548_v36 = vld [vmem:[#allocation5 + $0xd0] sm:$0xf]  ;;  %v2891_v1 = vld [vmem:[#allocation5 + $0x44] sm:$0xf0] }
  0x5e   : > { %822 = vmatmul.bf16.gmra.mxu1 %v3480_v11  ;;  %841 = vmatmul.bf16.gmra.mxu2 %v3478_v4  ;;  %v2909_v62 = vld [vmem:[#allocation5 + $0xd4] sm:$0xf0]  ;;  %v2540_v2 = vld [vmem:[#allocation5 + $0xc0] sm:$0xf]  ;;  %v2468_v6 = vld [vmem:[#allocation5 + $0x30] sm:$0xf] }
  0x5f   : > { %908 = vmatpush.bf16.msrb.mxu2 %v2248_v0  ;;  %860 = vmatmul.bf16.gmra.mxu3 %v3480_v11  ;;  %v2549_v63 = vor.u32 %v2909_v62, %v2548_v36  ;;  %v2476_v0 = vld [vmem:[#allocation5 + $0x40] sm:$0xf]  ;;  %v2889_v7 = vld [vmem:[#allocation5 + $0x34] sm:$0xf0]  ;;  %v2903_v18 = vld [vmem:[#allocation5 + $0xa4] sm:$0xf0] }
  0x60   : > { %927 = vmatpush.bf16.msrb.mxu3 %v2376_v5  ;;  %870 = vmatpush.bf16.msrb.mxu0 %v2244_v14  ;;  %v2477_v3 = vor.u32 %v2891_v1, %v2476_v0  ;;  %v2469_v10 = vor.u32 %v2889_v7, %v2468_v6  ;;  %v2905_v12 = vld [vmem:[#allocation5 + $0xb4] sm:$0xf0]  ;;  %v2460_v14 = vld [vmem:[#allocation5 + $0x20] sm:$0xf]  ;;  %v2452_v21 = vld [vmem:[#allocation5 + $0x10] sm:$0xf] }
  0x61   : > { %889 = vmatpush.bf16.msrb.mxu1 %v2372_v15  ;;  %v2887_v15 = vld [vmem:[#allocation5 + $0x24] sm:$0xf0]  ;;  %v2885_v22 = vld [vmem:[#allocation5 + $0x14] sm:$0xf0]  ;;  %v2516_v24 = vld [vmem:[#allocation5 + $0x90] sm:$0xf] }
  0x62   : > { %v2461_v17 = vor.u32 %v2887_v15, %v2460_v14  ;;  %v2453_v25 = vor.u32 %v2885_v22, %v2452_v21  ;;  %v2901_v26 = vld [vmem:[#allocation5 + $0x94] sm:$0xf0]  ;;  %v2444_v32 = vld [vmem:[#allocation5] sm:$0xf]  ;;  %v2883_v33 = vld [vmem:[#allocation5 + $0x4] sm:$0xf0] }
  0x63   : > { %909 = vmatpush.bf16.msrb.mxu2 %v2232_v16  ;;  %v2524_v16 = vld [vmem:[#allocation5 + $0xa0] sm:$0xf]  ;;  %v2899_v37 = vld [vmem:[#allocation5 + $0x84] sm:$0xf0]  ;;  %v2628_v39 = vld [vmem:[#allocation5 + $0x170] sm:$0xf] }
  0x64   : > { %928 = vmatpush.bf16.msrb.mxu3 %v2360_v20  ;;  %871 = vmatpush.bf16.msrb.mxu0 %v2228_v27  ;;  %v2525_v19 = vor.u32 %v2903_v18, %v2524_v16  ;;  %v3497_v20 = vld [vmem:[%s3633_s1 + $0x2] ss:$8 sm:$0xf]  ;;  %v2896_v30 = vld [vmem:[#allocation5 + $0x74] sm:$0xf]  ;;  %s2063_s14 = sshll.u32 %s2060_s22, 4  ;;  %s2064_s14 = int_to_ptr.hbm [resolvable:$true] %s2063_s14 }
  0x65   : > { %890 = vmatpush.bf16.msrb.mxu1 %v2356_v29  ;;  %v951_v27 = vperm.slane %v3497_v20, 0  ;;  %v952_v29 = vperm.slane %v3497_v20, 1  ;;  %v2508_v34 = vld [vmem:[#allocation5 + $0x80] sm:$0xf]  ;;  %v2929_v40 = vld [vmem:[#allocation5 + $0x174] sm:$0xf0] }
  0x66   : > { %v2509_v38 = vor.u32 %v2899_v37, %v2508_v34  ;;  %v2502_v44 = vld [vmem:[#allocation5 + $0x78] sm:$0xf0]  ;;  %v2912_v49 = vld [vmem:[#allocation5 + $0xf4] sm:$0xf]  ;;  %v2943_v28 = vld [vmem:[#allocation5 + $0x1e4] sm:$0xf0] }
  0x67   : > { %910 = vmatpush.bf16.msrb.mxu2 %v2216_v31  ;;  %v2517_v31 = vor.u32 %v2901_v26, %v2516_v24  ;;  %v959_v23 = vpack.c.bf16 %v952_v29, %v951_v27  ;;  %v2505_v48 = vor.u32 %v2896_v30, %v2502_v44  ;;  %v2566_v50 = vld [vmem:[#allocation5 + $0xf8] sm:$0xf0]  ;;  %v2894_v57 = vld [vmem:[#allocation5 + $0x64] sm:$0xf]  ;;  %v2558_v62 = vld [vmem:[#allocation5 + $0xe8] sm:$0xf0] }
  0x68   : > { %929 = vmatpush.bf16.msrb.mxu3 %v2344_v35  ;;  %872 = vmatpush.bf16.msrb.mxu0 %v2212_v41  ;;  %v2445_v35 = vor.u32 %v2883_v33, %v2444_v32  ;;  %v2692_v41 = vld [vmem:[#allocation5 + $0x1f0] sm:$0xf]  ;;  %v2569_v51 = vor.u32 %v2912_v49, %v2566_v50  ;;  %v2925_v1 = vld [vmem:[#allocation5 + $0x154] sm:$0xf0]  ;;  %v2486_v6 = vld [vmem:[#allocation5 + $0x58] sm:$0xf0] }
  0x69   : > { %891 = vmatpush.bf16.msrb.mxu1 %v2340_v42  ;;  %v2629_v42 = vor.u32 %v2929_v40, %v2628_v39  ;;  %v963_v45 = vunpack.c.l.b16 %v959_v23  ;;  %v2612_v0 = vld [vmem:[#allocation5 + $0x150] sm:$0xf]  ;;  %v2550_v14 = vld [vmem:[#allocation5 + $0xd8] sm:$0xf0]  ;;  %v2604_v18 = vld [vmem:[#allocation5 + $0x140] sm:$0xf] }
  0x6a   : > { %v2668_v21 = vld [vmem:[#allocation5 + $0x1c0] sm:$0xf]  ;;  %v2939_v26 = vld [vmem:[#allocation5 + $0x1c4] sm:$0xf0]  ;;  %v2890_v27 = vld [vmem:[#allocation5 + $0x44] sm:$0xf] }
  0x6b   : > { %911 = vmatpush.bf16.msrb.mxu2 %v2200_v43  ;;  %v2945_v43 = vld [vmem:[#allocation5 + $0x1f4] sm:$0xf0]  ;;  %v2478_v29 = vld [vmem:[#allocation5 + $0x48] sm:$0xf0]  ;;  %v2906_v37 = vld [vmem:[#allocation5 + $0xc4] sm:$0xf] }
  0x6c   : > { %930 = vmatpush.bf16.msrb.mxu3 %v2328_v46  ;;  %873 = vmatpush.bf16.msrb.mxu0 %v2196_v52  ;;  %v964_v46 = vunpack.c.h.b16 %v959_v23  ;;  %v2693_v47 = vor.u32 %v2945_v43, %v2692_v41  ;;  %v2620_v52 = vld [vmem:[#allocation5 + $0x160] sm:$0xf]  ;;  %v2542_v23 = vld [vmem:[#allocation5 + $0xc8] sm:$0xf0]  ;;  %v2596_v41 = vld [vmem:[#allocation5 + $0x130] sm:$0xf] }
  0x6d   : > { %892 = vmatpush.bf16.msrb.mxu1 %v2324_v53  ;;  %v2927_v53 = vld [vmem:[#allocation5 + $0x164] sm:$0xf0]  ;;  %v2545_v39 = vor.u32 %v2906_v37, %v2542_v23  ;;  %v2660_v30 = vld [vmem:[#allocation5 + $0x1b0] sm:$0xf]  ;;  %v2937_v44 = vld [vmem:[#allocation5 + $0x1b4] sm:$0xf0] }
  0x6e   : > { %912 = vmatmul.bf16.vlgmr.msrb.gmra.mxu2 %v3462_v8  ;;  %v2621_v56 = vor.u32 %v2927_v53, %v2620_v52  ;;  %v2470_v49 = vld [vmem:[#allocation5 + $0x38] sm:$0xf0]  ;;  %v2904_v50 = vld [vmem:[#allocation5 + $0xb4] sm:$0xf]  ;;  %v2661_v53 = vor.u32 %v2937_v44, %v2660_v30  ;;  %v2572_v37 = vld [vmem:[#allocation5 + $0x100] sm:$0xf] }
  0x6f   : > { %874 = vmatmul.bf16.vlgmr.msrb.gmra.mxu0 %v3462_v8  ;;  %931 = vmatmul.bf16.vlgmr.msrb.gmra.mxu3 %v3464_v9  ;;  %v2484_v8 = vld [vmem:[#allocation5 + $0x50] sm:$0xf]  ;;  %v2915_v23 = vld [vmem:[#allocation5 + $0x104] sm:$0xf0]  ;;  %v2882_v30 = vld [vmem:[#allocation5 + $0x4] sm:$0xf] }
  0x70   : > { %1457 = vmatpush.bf16.msra.mxu0 %v2501_v54  ;;  %893 = vmatmul.bf16.vlgmr.msrb.gmra.mxu1 %v3464_v9  ;;  %v2485_v9 = vor.u32 %v2893_v61, %v2484_v8  ;;  %v2684_v54 = vld [vmem:[#allocation5 + $0x1e0] sm:$0xf]  ;;  %v968_v8 = vpack.c.b16 %v964_v46, %v964_v46  ;;  %v2446_v44 = vld [vmem:[#allocation5 + $0x8] sm:$0xf0]  ;;  %s2049_s15 = scalar_lea.sflag [#allocation4], %s339_s29  ;;  %s3208_s17 = sshra.s32 %s2064_s14, 4  ;;  %s3209_s17 = int_to_ptr.hbm [resolvable:$true] %s3208_s17 }
  0x71   : > { %1476 = vmatpush.bf16.msra.mxu1 %v2565_v55  ;;  %1495 = vmatpush.bf16.msra.mxu2 %v2629_v42  ;;  %v2685_v61 = vor.u32 %v2943_v28, %v2684_v54  ;;  %v2921_v42 = vld [vmem:[#allocation5 + $0x134] sm:$0xf0]  ;;  %v2588_v28 = vld [vmem:[#allocation5 + $0x120] sm:$0xf]  ;;  %s3210_s20 = scalar_lea.hbm %s3209_s17, 16  ;;  %s3214_s16 = scalar_lea.hbm %s3639_s7, 32 }
  0x72   : > { %1514 = vmatpush.bf16.msra.mxu3 %v2693_v47  ;;  %v2597_v43 = vor.u32 %v2921_v42, %v2596_v41  ;;  %v2573_v42 = vor.u32 %v2915_v23, %v2572_v37  ;;  %v2670_v37 = vld [vmem:[#allocation5 + $0x1c8] sm:$0xf0]  ;;  %p3211_p0 = scmp.ne.s32.totalorder %s3209_s17, %s3210_s20  ;;  %p3215_p3 = scmp.lt.s32.totalorder %s3209_s17, %s3639_s7 }
  0x73   : > { %p3216_p4 = scmp.lt.s32.totalorder %s3214_s16, %s3210_s20 }
  0x74   : > { %1458 = vmatpush.bf16.msra.mxu0 %v2493_v58  ;;  %v2494_v58 = vld [vmem:[#allocation5 + $0x68] sm:$0xf0]  ;;  %p3212_p1 = pnand %p3211_p0, %p3360_p5 }
  0x75   : > { %1477 = vmatpush.bf16.msra.mxu1 %v2557_v60  ;;  %v967_v60 = vpack.c.b16 %v963_v45, %v963_v45  ;;  %v2497_v36 = vor.u32 %v2894_v57, %v2494_v58  ;;  %1496 = vmatpush.bf16.msra.mxu2 %v2621_v56  ;;  %v2888_v45 = vld [vmem:[#allocation5 + $0x34] sm:$0xf]  ;;  %v2919_v57 = vld [vmem:[#allocation5 + $0x124] sm:$0xf0]  ;;  %v2652_v58 = vld [vmem:[#allocation5 + $0x1a0] sm:$0xf]  ;;  %p3217_p7 = por %p3216_p4, %p3215_p3 }
  0x76   : > { %1515 = vmatpush.bf16.msra.mxu3 %v2685_v61  ;;  %v2473_v54 = vor.u32 %v2888_v45, %v2470_v49  ;;  %v2935_v61 = vld [vmem:[#allocation5 + $0x1a4] sm:$0xf0]  ;;  %p3213_p2 = pneg %p3212_p1 }
  0x77   : > { %v972_v7 = vpack.i.b16 %v967_v60, %v967_v60 }
  0x78   : > { %1459 = vmatpush.bf16.msra.mxu0 %v2485_v9  ;;  %v2910_v9 = vld [vmem:[#allocation5 + $0xe4] sm:$0xf]  ;;  %p3218_p8 = pnand %p3217_p7, %p3213_p2 }
  0x79   : > { %1478 = vmatpush.bf16.msra.mxu1 %v2549_v63  ;;  %v2561_v63 = vor.u32 %v2910_v9, %v2558_v62  ;;  %v974_v32 = vperm.slane %v972_v7, 0  ;;  %v2462_v9 = vld [vmem:[#allocation5 + $0x28] sm:$0xf0] }
  0x7b   : > { %v3501_v47 = vunpack.c.l.bf16 %v974_v32 }
  0x7c   : > { %1460 = vmatpush.bf16.msra.mxu0 %v2477_v3  ;;  %v2613_v3 = vor.u32 %v2925_v1, %v2612_v0  ;;  %v953_v1 = vperm.slane %v3497_v20, 2 }
  0x7e   : > { %917 = vmatmul.bf16.gmra.mxu2 %v3478_v4 }
  0x7f   : > { %879 = vmatmul.bf16.gmra.mxu0 %v3478_v4  ;;  %936 = vmatmul.bf16.gmra.mxu3 %v3480_v11  ;;  %v2907_v4 = vld [vmem:[#allocation5 + $0xc4] sm:$0xf0] }
  0x80   : > { %898 = vmatmul.bf16.gmra.mxu1 %v3480_v11  ;;  %v2541_v5 = vor.u32 %v2907_v4, %v2540_v2  ;;  %v2532_v11 = vld [vmem:[#allocation5 + $0xb0] sm:$0xf]  ;;  %1461 = vmatpush.bf16.msra.mxu0 %v2469_v10  ;;  %v2941_v4 = vld [vmem:[#allocation5 + $0x1d4] sm:$0xf0]  ;;  %v976_v10 = vpack.i.b16 %v968_v8, %v968_v8  ;;  %v2589_v8 = vor.u32 %v2919_v57, %v2588_v28 }
  0x81   : > { %v2533_v13 = vor.u32 %v2905_v12, %v2532_v11  ;;  %v2676_v2 = vld [vmem:[#allocation5 + $0x1d0] sm:$0xf]  ;;  %1497 = vmatpush.bf16.msra.mxu2 %v2613_v3  ;;  %v2902_v3 = vld [vmem:[#allocation5 + $0xa4] sm:$0xf] }
  0x82   : > { %1479 = vmatpush.bf16.msra.mxu1 %v2541_v5  ;;  %v2892_v5 = vld [vmem:[#allocation5 + $0x54] sm:$0xf]  ;;  %v2677_v11 = vor.u32 %v2941_v4, %v2676_v2  ;;  %v978_v33 = vperm.slane %v976_v10, 0  ;;  %v2653_v2 = vor.u32 %v2935_v61, %v2652_v58  ;;  %v2526_v4 = vld [vmem:[#allocation5 + $0xa8] sm:$0xf0] }
  0x83   : > { %v2489_v12 = vor.u32 %v2892_v5, %v2486_v6  ;;  %v2529_v10 = vor.u32 %v2902_v3, %v2526_v4  ;;  %v2928_v58 = vld [vmem:[#allocation5 + $0x174] sm:$0xf]  ;;  %v2694_v61 = vld [vmem:[#allocation5 + $0x1f8] sm:$0xf0]  ;;  %v2622_v3 = vld [vmem:[#allocation5 + $0x168] sm:$0xf0] }
  0x84   : > { %1462 = vmatpush.bf16.msra.mxu0 %v2461_v17  ;;  %1516 = vmatpush.bf16.msra.mxu3 %v2677_v11  ;;  %v2942_v4 = vld [vmem:[#allocation5 + $0x1e4] sm:$0xf] }
  0x86   : > { %1480 = vmatpush.bf16.msra.mxu1 %v2533_v13  ;;  %v2908_v13 = vld [vmem:[#allocation5 + $0xd4] sm:$0xf] }
  0x87   : > { %v2553_v15 = vor.u32 %v2908_v13, %v2550_v14  ;;  %v2917_v13 = vld [vmem:[#allocation5 + $0x114] sm:$0xf0]  ;;  %v2644_v14 = vld [vmem:[#allocation5 + $0x190] sm:$0xf] }
  0x88   : > { %1463 = vmatpush.bf16.msra.mxu0 %v2453_v25 }
  0x8a   : > { %1481 = vmatpush.bf16.msra.mxu1 %v2525_v19  ;;  %v2923_v19 = vld [vmem:[#allocation5 + $0x144] sm:$0xf0] }
  0x8b   : > { %v2605_v25 = vor.u32 %v2923_v19, %v2604_v18  ;;  %v2454_v18 = vld [vmem:[#allocation5 + $0x18] sm:$0xf0] }
  0x8c   : > { %1464 = vmatpush.bf16.msra.mxu0 %v2445_v35  ;;  %v2669_v35 = vor.u32 %v2939_v26, %v2668_v21  ;;  %v2518_v26 = vld [vmem:[#allocation5 + $0x98] sm:$0xf0] }
  0x8d   : > { %1498 = vmatpush.bf16.msra.mxu2 %v2605_v25  ;;  %v2900_v25 = vld [vmem:[#allocation5 + $0x94] sm:$0xf] }
  0x8e   : > { %1482 = vmatpush.bf16.msra.mxu1 %v2517_v31  ;;  %1517 = vmatpush.bf16.msra.mxu3 %v2669_v35  ;;  %v2521_v32 = vor.u32 %v2900_v25, %v2518_v26 }
  0x90   : > { %1533 = vmatpush.bf16.msrb.mxu0 %v2505_v48  ;;  %v3503_v48 = vunpack.c.l.bf16 %v978_v33 }
  0x91   : > { %1499 = vmatpush.bf16.msra.mxu2 %v2597_v43  ;;  %v2931_v43 = vld [vmem:[#allocation5 + $0x184] sm:$0xf0] }
  0x92   : > { %1483 = vmatpush.bf16.msra.mxu1 %v2509_v38  ;;  %v2481_v38 = vor.u32 %v2890_v27, %v2478_v29  ;;  %1518 = vmatpush.bf16.msra.mxu3 %v2661_v53 }
  0x94   : > { %1534 = vmatpush.bf16.msrb.mxu0 %v2497_v36  ;;  %v2886_v36 = vld [vmem:[#allocation5 + $0x24] sm:$0xf] }
  0x95   : > { %1500 = vmatpush.bf16.msra.mxu2 %v2589_v8  ;;  %v2465_v7 = vor.u32 %v2886_v36, %v2462_v9 }
  0x96   : > { %1552 = vmatpush.bf16.msrb.mxu1 %v2569_v51  ;;  %v2534_v51 = vld [vmem:[#allocation5 + $0xb8] sm:$0xf0]  ;;  %1519 = vmatpush.bf16.msra.mxu3 %v2653_v2  ;;  %v2926_v2 = vld [vmem:[#allocation5 + $0x164] sm:$0xf] }
  0x98   : > { %1535 = vmatpush.bf16.msrb.mxu0 %v2489_v12  ;;  %v2580_v12 = vld [vmem:[#allocation5 + $0x110] sm:$0xf] }
  0x9a   : > { %1553 = vmatpush.bf16.msrb.mxu1 %v2561_v63 }
  0x9c   : > { %1536 = vmatpush.bf16.msrb.mxu0 %v2481_v38  ;;  %v2636_v38 = vld [vmem:[#allocation5 + $0x180] sm:$0xf] }
  0x9e   : > { %1554 = vmatpush.bf16.msrb.mxu1 %v2553_v15  ;;  %v2581_v15 = vor.u32 %v2917_v13, %v2580_v12  ;;  %v2686_v12 = vld [vmem:[#allocation5 + $0x1e8] sm:$0xf0] }
  0xa0   : > { %1537 = vmatpush.bf16.msrb.mxu0 %v2473_v54  ;;  %1501 = vmatpush.bf16.msra.mxu2 %v2581_v15  ;;  %v2449_v54 = vor.u32 %v2882_v30, %v2446_v44  ;;  %v2689_v15 = vor.u32 %v2942_v4, %v2686_v12 }
  0xa2   : > { %1555 = vmatpush.bf16.msrb.mxu1 %v2545_v39 }
  0xa4   : > { %1538 = vmatpush.bf16.msrb.mxu0 %v2465_v7  ;;  %1502 = vmatpush.bf16.msra.mxu2 %v2573_v42 }
  0xca   : > { %v799_v55 = vpop.f32.mrf.mxu0 }
  0xcb   : > { %v818_v59 = vpop.f32.mrf.mxu1 }
  0xcc   : > { %v819_v16 = vadd.f32 %v818_v59, %v799_v55  ;;  %v2537_v55 = vor.u32 %v2904_v50, %v2534_v51  ;;  %v2637_v50 = vor.u32 %v2931_v43, %v2636_v38  ;;  %v2898_v51 = vld [vmem:[#allocation5 + $0x84] sm:$0xf] }
  0xce   : > { %1556 = vmatpush.bf16.msrb.mxu1 %v2537_v55 }
  0xd1   : > { %v837_v17 = vpop.f32.mrf.mxu2 }
  0xd2   : > { %v856_v22 = vpop.f32.mrf.mxu3  ;;  %v801_v24 = vpop.f32.mrf.mxu0  ;;  %1557 = vmatpush.bf16.msrb.mxu1 %v2529_v10 }
  0xd3   : > { %v857_v31 = vadd.f32 %v856_v22, %v837_v17  ;;  %v820_v34 = vpop.f32.mrf.mxu1  ;;  %v2884_v17 = vld [vmem:[#allocation5 + $0x14] sm:$0xf] }
  0xd4   : > { %v821_v62 = vadd.f32 %v820_v34, %v801_v24  ;;  %v2457_v24 = vor.u32 %v2884_v17, %v2454_v18 }
  0xd5   : > { %v942_v40 = vpack.c.bf16 %v857_v31, %v819_v16  ;;  %v2933_v16 = vld [vmem:[#allocation5 + $0x194] sm:$0xf0]  ;;  %v954_v31 = vperm.slane %v3497_v20, 3 }
  0xd6   : > { %v2645_v22 = vor.u32 %v2933_v16, %v2644_v14  ;;  %1539 = vmatpush.bf16.msrb.mxu0 %v2457_v24  ;;  %1558 = vmatpush.bf16.msrb.mxu1 %v2521_v32  ;;  %v2606_v32 = vld [vmem:[#allocation5 + $0x148] sm:$0xf0] }
  0xd7   : > { %v987_v46 = vunpack.c.l.bf16 %v942_v40  ;;  %v988_v52 = vunpack.c.h.bf16 %v942_v40  ;;  %v960_v53 = vpack.c.bf16 %v954_v31, %v953_v1  ;;  %v2922_v31 = vld [vmem:[#allocation5 + $0x144] sm:$0xf] }
  0xd8   : > { %1520 = vmatpush.bf16.msra.mxu3 %v2645_v22  ;;  %v2940_v22 = vld [vmem:[#allocation5 + $0x1d4] sm:$0xf] }
  0xd9   : > { %v839_v56 = vpop.f32.mrf.mxu2  ;;  %v1007_v5 = vadd.f32 %v3501_v47, %v987_v46  ;;  %v1008_v6 = vadd.f32 %v3503_v48, %v988_v52  ;;  %v2510_v52 = vld [vmem:[#allocation5 + $0x88] sm:$0xf0]  ;;  %v965_v36 = vunpack.c.l.b16 %v960_v53 }
  0xda   : > { %v858_v59 = vpop.f32.mrf.mxu3  ;;  %v804_v60 = vpop.f32.mrf.mxu0  ;;  %v2513_v55 = vor.u32 %v2898_v51, %v2510_v52  ;;  %1540 = vmatpush.bf16.msrb.mxu0 %v2449_v54 }
  0xdb   : > { %v859_v63 = vadd.f32 %v858_v59, %v839_v56  ;;  %v823_v0 = vpop.f32.mrf.mxu1  ;;  %v1047_v27 = vmax.f32 %v1007_v5, 0.0  ;;  %v1048_v29 = vmax.f32 %v1008_v6, 0.0  ;;  %v2630_v59 = vld [vmem:[#allocation5 + $0x178] sm:$0xf0]  ;;  %v969_v14 = vpack.c.b16 %v965_v36, %v965_v36  ;;  %v2590_v36 = vld [vmem:[#allocation5 + $0x128] sm:$0xf0] }
  0xdc   : > { %v824_v39 = vadd.f32 %v823_v0, %v804_v60  ;;  %1521 = vmatpush.bf16.msra.mxu3 %v2637_v50  ;;  %v2944_v60 = vld [vmem:[#allocation5 + $0x1f4] sm:$0xf]  ;;  %v2633_v8 = vor.u32 %v2928_v58, %v2630_v59  ;;  %1559 = vmatpush.bf16.msrb.mxu1 %v2513_v55 }
  0xdd   : > { %v944_v11 = vpack.c.bf16 %v859_v63, %v821_v62  ;;  %v2697_v9 = vor.u32 %v2944_v60, %v2694_v61  ;;  %v966_v63 = vunpack.c.h.b16 %v960_v53  ;;  %v2920_v55 = vld [vmem:[#allocation5 + $0x134] sm:$0xf]  ;;  %v2662_v60 = vld [vmem:[#allocation5 + $0x1b8] sm:$0xf0]  ;;  %v2918_v61 = vld [vmem:[#allocation5 + $0x124] sm:$0xf] }
  0xde   : > { %1571 = vmatpush.bf16.msrb.mxu2 %v2633_v8  ;;  %v2936_v58 = vld [vmem:[#allocation5 + $0x1b4] sm:$0xf] }
  0xdf   : > { %v991_v19 = vunpack.c.l.bf16 %v944_v11  ;;  %v992_v21 = vunpack.c.h.bf16 %v944_v11  ;;  %v2625_v11 = vor.u32 %v2926_v2, %v2622_v3  ;;  %v970_v17 = vpack.c.b16 %v966_v63, %v966_v63 }
  0xe0   : > { %1590 = vmatpush.bf16.msrb.mxu3 %v2697_v9  ;;  %v2665_v8 = vor.u32 %v2936_v58, %v2662_v60  ;;  %v2934_v9 = vld [vmem:[#allocation5 + $0x1a4] sm:$0xf] }
  0xe1   : > { %v1011_v33 = vadd.f32 %v3501_v47, %v991_v19  ;;  %v1012_v34 = vadd.f32 %v3503_v48, %v992_v21  ;;  %v842_v35 = vpop.f32.mrf.mxu2  ;;  %v2924_v19 = vld [vmem:[#allocation5 + $0x154] sm:$0xf]  ;;  %v2614_v21 = vld [vmem:[#allocation5 + $0x158] sm:$0xf0]  ;;  %v984_v38 = vpack.i.b16 %v970_v17, %v970_v17 }
  0xe2   : > { %v861_v40 = vpop.f32.mrf.mxu3  ;;  %v806_v41 = vpop.f32.mrf.mxu0  ;;  %1572 = vmatpush.bf16.msrb.mxu2 %v2625_v11 }
  0xe3   : > { %v1051_v20 = vmax.f32 %v1011_v33, 0.0  ;;  %v1052_v45 = vmax.f32 %v1012_v34, 0.0  ;;  %v862_v46 = vadd.f32 %v861_v40, %v842_v35  ;;  %v825_v49 = vpop.f32.mrf.mxu1  ;;  %v980_v33 = vpack.i.b16 %v969_v14, %v969_v14  ;;  %v2938_v35 = vld [vmem:[#allocation5 + $0x1c4] sm:$0xf]  ;;  %v2646_v14 = vld [vmem:[#allocation5 + $0x198] sm:$0xf0] }
  0xe4   : > { %v826_v6 = vadd.f32 %v825_v49, %v806_v41  ;;  %1591 = vmatpush.bf16.msrb.mxu3 %v2689_v15  ;;  %v2609_v41 = vor.u32 %v2922_v31, %v2606_v32  ;;  %v2673_v44 = vor.u32 %v2938_v35, %v2670_v37  ;;  %v986_v53 = vperm.slane %v984_v38, 0  ;;  %v2638_v31 = vld [vmem:[#allocation5 + $0x188] sm:$0xf0] }
  0xe5   : > { %v3511_v56 = vpack.c.bf16 %v1051_v20, %v1047_v27  ;;  %v3513_v28 = vpack.c.bf16 %v1052_v45, %v1048_v29  ;;  %v946_v57 = vpack.c.bf16 %v862_v46, %v824_v39  ;;  %v2617_v27 = vor.u32 %v2924_v19, %v2614_v21  ;;  %v2678_v29 = vld [vmem:[#allocation5 + $0x1d8] sm:$0xf0] }
  0xe6   : > { %v2681_v34 = vor.u32 %v2940_v22, %v2678_v29  ;;  %v982_v52 = vperm.slane %v980_v33, 0  ;;  %v1006_v4 = vunpack.c.l.bf16 %v986_v53  ;;  %v2930_v29 = vld [vmem:[#allocation5 + $0x184] sm:$0xf] }
  0xe7   : > { %1465 = vmatmul.bf16.vlgmr.msra.gmra.mxu0 %v3511_v56  ;;  %1484 = vmatmul.bf16.vlgmr.msra.gmra.mxu1 %v3513_v28  ;;  %v995_v0 = vunpack.c.l.bf16 %v946_v57  ;;  %v996_v5 = vunpack.c.h.bf16 %v946_v57  ;;  %v2598_v57 = vld [vmem:[#allocation5 + $0x138] sm:$0xf0] }
  0xe8   : > { %1573 = vmatpush.bf16.msrb.mxu2 %v2617_v27  ;;  %1592 = vmatpush.bf16.msrb.mxu3 %v2681_v34  ;;  %v2601_v59 = vor.u32 %v2920_v55, %v2598_v57 }
  0xe9   : > { %v844_v62 = vpop.f32.mrf.mxu2  ;;  %v1015_v18 = vadd.f32 %v3501_v47, %v995_v0  ;;  %v1016_v26 = vadd.f32 %v3503_v48, %v996_v5  ;;  %v2593_v0 = vor.u32 %v2918_v61, %v2590_v36 }
  0xea   : > { %v863_v1 = vpop.f32.mrf.mxu3 }
  0xeb   : > { %v864_v7 = vadd.f32 %v863_v1, %v844_v62  ;;  %v1055_v30 = vmax.f32 %v1015_v18, 0.0  ;;  %v1056_v46 = vmax.f32 %v1016_v26, 0.0  ;;  %v3527_v62 = vunpack.c.l.bf16 %v982_v52  ;;  %v2654_v1 = vld [vmem:[#allocation5 + $0x1a8] sm:$0xf0] }
  0xec   : > { %v875_v10 = vpop.f32.mrf.mxu0  ;;  %1574 = vmatpush.bf16.msrb.mxu2 %v2609_v41  ;;  %1593 = vmatpush.bf16.msrb.mxu3 %v2673_v44 }
  0xed   : > { %v894_v13 = vpop.f32.mrf.mxu1  ;;  %v948_v16 = vpack.c.bf16 %v864_v7, %v826_v6  ;;  %v2657_v6 = vor.u32 %v2934_v9, %v2654_v1  ;;  %v2916_v7 = vld [vmem:[#allocation5 + $0x114] sm:$0xf] }
  0xee   : > { %v895_v42 = vadd.f32 %v894_v13, %v875_v10  ;;  %v2582_v10 = vld [vmem:[#allocation5 + $0x118] sm:$0xf0]  ;;  %v2932_v13 = vld [vmem:[#allocation5 + $0x194] sm:$0xf] }
  0xef   : > { %v999_v24 = vunpack.c.l.bf16 %v948_v16  ;;  %v1000_v25 = vunpack.c.h.bf16 %v948_v16  ;;  %v2585_v16 = vor.u32 %v2916_v7, %v2582_v10  ;;  %v2649_v22 = vor.u32 %v2932_v13, %v2646_v14  ;;  %v2960_v7 = vld [vmem:[#allocation7 + $0x70] sm:$0xff]  ;;  %v2950_v14 = vld [vmem:[#allocation7 + $0x20] sm:$0xff] }
  0xf0   : > { %1575 = vmatpush.bf16.msrb.mxu2 %v2601_v59  ;;  %1594 = vmatpush.bf16.msrb.mxu3 %v2665_v8 }
  0xf1   : > { %v913_v23 = vpop.f32.mrf.mxu2  ;;  %v1019_v39 = vadd.f32 %v3501_v47, %v999_v24  ;;  %v1020_v40 = vadd.f32 %v3503_v48, %v1000_v25  ;;  %v2914_v24 = vld [vmem:[#allocation5 + $0x104] sm:$0xf]  ;;  %v2574_v25 = vld [vmem:[#allocation5 + $0x108] sm:$0xf0] }
  0xf2   : > { %v932_v43 = vpop.f32.mrf.mxu3  ;;  %v2577_v35 = vor.u32 %v2914_v24, %v2574_v25  ;;  %v2948_v24 = vld [vmem:[#allocation7 + $0x10] sm:$0xff] }
  0xf3   : > { %v933_v20 = vadd.f32 %v932_v43, %v913_v23  ;;  %v1059_v45 = vmax.f32 %v1019_v39, 0.0  ;;  %v1060_v49 = vmax.f32 %v1020_v40, 0.0  ;;  %v2641_v39 = vor.u32 %v2930_v29, %v2638_v31  ;;  %v2956_v25 = vld [vmem:[#allocation7 + $0x50] sm:$0xff]  ;;  %v2955_v29 = vld [vmem:[#allocation7 + $0x48] sm:$0xff] }
  0xf4   : > { %v877_v50 = vpop.f32.mrf.mxu0  ;;  %1576 = vmatpush.bf16.msrb.mxu2 %v2593_v0  ;;  %1595 = vmatpush.bf16.msrb.mxu3 %v2657_v6  ;;  %v2952_v6 = vld [vmem:[#allocation7 + $0x30] sm:$0xff] }
  0xf5   : > { %v896_v51 = vpop.f32.mrf.mxu1  ;;  %v3521_v54 = vpack.c.bf16 %v1059_v45, %v1055_v30  ;;  %v3523_v47 = vpack.c.bf16 %v1060_v49, %v1056_v46  ;;  %v943_v48 = vpack.c.bf16 %v933_v20, %v895_v42 }
  0xf6   : > { %v897_v11 = vadd.f32 %v896_v51, %v877_v50 }
  0xf7   : > { %1470 = vmatmul.bf16.gmra.mxu0 %v3521_v54  ;;  %1489 = vmatmul.bf16.gmra.mxu1 %v3523_v47  ;;  %v989_v2 = vunpack.c.l.bf16 %v943_v48  ;;  %v990_v3 = vunpack.c.h.bf16 %v943_v48 }
  0xf8   : > { %1577 = vmatpush.bf16.msrb.mxu2 %v2585_v16  ;;  %1596 = vmatpush.bf16.msrb.mxu3 %v2649_v22  ;;  %v2949_v16 = vld [vmem:[#allocation7 + $0x18] sm:$0xff] }
  0xf9   : > { %v915_v63 = vpop.f32.mrf.mxu2  ;;  %v1009_v17 = vadd.f32 %v3527_v62, %v989_v2  ;;  %v1010_v18 = vadd.f32 %v1006_v4, %v990_v3  ;;  %v2961_v3 = vld [vmem:[#allocation7 + $0x78] sm:$0xff] }
  0xfa   : > { %v934_v5 = vpop.f32.mrf.mxu3  ;;  %1822 = vmatpush.bf16.msra.mxu1 %v2961_v3 }
  0xfb   : > { %v935_v12 = vadd.f32 %v934_v5, %v915_v63  ;;  %v1049_v37 = vmax.f32 %v1009_v17, 0.0  ;;  %v1050_v23 = vmax.f32 %v1010_v18, 0.0  ;;  %v2957_v17 = vld [vmem:[#allocation7 + $0x58] sm:$0xff] }
  0xfc   : > { %v880_v19 = vpop.f32.mrf.mxu0  ;;  %1578 = vmatpush.bf16.msrb.mxu2 %v2577_v35  ;;  %1597 = vmatpush.bf16.msrb.mxu3 %v2641_v39  ;;  %v2946_v35 = vld [vmem:[#allocation7] sm:$0xff] }
  0xfd   : > { %v945_v15 = vpack.c.bf16 %v935_v12, %v897_v11  ;;  %v899_v21 = vpop.f32.mrf.mxu1 }
  0xfe   : > { %v900_v42 = vadd.f32 %v899_v21, %v880_v19  ;;  %1823 = vmatpush.bf16.msra.mxu1 %v2960_v7 }
  0xff   : > { %v993_v26 = vunpack.c.l.bf16 %v945_v15  ;;  %v994_v27 = vunpack.c.h.bf16 %v945_v15  ;;  %v2958_v15 = vld [vmem:[#allocation7 + $0x60] sm:$0xff] }
 0x101   : > { %v1013_v32 = vadd.f32 %v3527_v62, %v993_v26  ;;  %v1014_v33 = vadd.f32 %v1006_v4, %v994_v27  ;;  %v918_v34 = vpop.f32.mrf.mxu2  ;;  %v2441_v26 = vld [vmem:[%s3633_s1 + $0x3] ss:$8 sm:$0x3] }
 0x102   : > { %v937_v38 = vpop.f32.mrf.mxu3  ;;  %v2947_v27 = vld [vmem:[#allocation7 + $0x8] sm:$0xff] }
 0x103   : > { %v1053_v40 = vmax.f32 %v1013_v32, 0.0  ;;  %v1054_v41 = vmax.f32 %v1014_v33, 0.0  ;;  %v938_v43 = vadd.f32 %v937_v38, %v918_v34  ;;  %v1614_v33 = vperm.slane %v2441_v26, 0 }
 0x104   : > { %v882_v45 = vpop.f32.mrf.mxu0  ;;  %v1615_v34 = vperm.slane %v2441_v26, 1 }
 0x105   : > { %v1065_v30 = vpack.c.bf16 %v1053_v40, %v1049_v37  ;;  %v1066_v44 = vpack.c.bf16 %v1054_v41, %v1050_v23  ;;  %v947_v20 = vpack.c.bf16 %v938_v43, %v900_v42  ;;  %v901_v46 = vpop.f32.mrf.mxu1  ;;  %v2954_v37 = vld [vmem:[#allocation7 + $0x40] sm:$0xff] }
 0x106   : > { %v902_v53 = vadd.f32 %v901_v46, %v882_v45  ;;  %v1618_v39 = vpack.c.bf16 %v1615_v34, %v1614_v33 }
 0x107   : > { %1503 = vmatmul.bf16.vlgmr.msra.gmra.mxu2 %v1065_v30  ;;  %1522 = vmatmul.bf16.vlgmr.msra.gmra.mxu3 %v1066_v44  ;;  %v997_v51 = vunpack.c.l.bf16 %v947_v20  ;;  %v998_v52 = vunpack.c.h.bf16 %v947_v20 }
 0x108   : > { %1541 = vmatmul.bf16.vlgmr.msrb.gmra.mxu0 %v3511_v56  ;;  %1560 = vmatmul.bf16.vlgmr.msrb.gmra.mxu1 %v3513_v28  ;;  %v1620_v42 = vunpack.c.l.b16 %v1618_v39  ;;  %v1621_v43 = vunpack.c.h.b16 %v1618_v39 }
 0x109   : > { %v920_v49 = vpop.f32.mrf.mxu2  ;;  %v1017_v59 = vadd.f32 %v3527_v62, %v997_v51  ;;  %v1018_v60 = vadd.f32 %v1006_v4, %v998_v52 }
 0x10a   : > { %v939_v50 = vpop.f32.mrf.mxu3 }
 0x10b   : > { %v940_v48 = vadd.f32 %v939_v50, %v920_v49  ;;  %v1057_v36 = vmax.f32 %v1017_v59, 0.0  ;;  %v1058_v56 = vmax.f32 %v1018_v60, 0.0  ;;  %v1623_v49 = vpack.c.b16 %v1621_v43, %v1621_v43 }
 0x10d   : > { %v949_v55 = vpack.c.bf16 %v940_v48, %v902_v53 }
 0x10f   : > { %v1001_v57 = vunpack.c.l.bf16 %v949_v55  ;;  %v1002_v58 = vunpack.c.h.bf16 %v949_v55 }
 0x111   : > { %v1021_v8 = vadd.f32 %v3527_v62, %v1001_v57  ;;  %v1022_v61 = vadd.f32 %v1006_v4, %v1002_v58  ;;  %v2953_v62 = vld [vmem:[#allocation7 + $0x38] sm:$0xff]  ;;  %v1629_v57 = vpack.i.b16 %v1623_v49, %v1623_v49 }
 0x112   : > { %1803 = vmatpush.bf16.msra.mxu0 %v2953_v62 }
 0x113   : > { %v1061_v9 = vmax.f32 %v1021_v8, 0.0  ;;  %v1062_v63 = vmax.f32 %v1022_v61, 0.0 }
 0x115   : > { %v1069_v28 = vpack.c.bf16 %v1061_v9, %v1057_v36  ;;  %v1070_v0 = vpack.c.bf16 %v1062_v63, %v1058_v56  ;;  %v1631_v9 = vperm.slane %v1629_v57, 0  ;;  %v2969_v56 = vld [vmem:[%s3637_s5 + $0x38] sm:$0xff] }
 0x116   : > { %1804 = vmatpush.bf16.msra.mxu0 %v2952_v6  ;;  %1934 = vmatpush.bf16.msra.mxu2 %v2969_v56  ;;  %v2963_v56 = vld [vmem:[%s3637_s5 + $0x8] sm:$0xff] }
 0x117   : > { %1508 = vmatmul.bf16.gmra.mxu2 %v1069_v28  ;;  %1527 = vmatmul.bf16.gmra.mxu3 %v1070_v0  ;;  %v1641_v7 = vunpack.c.l.bf16 %v1631_v9  ;;  %v2964_v9 = vld [vmem:[%s3637_s5 + $0x10] sm:$0xff] }
 0x118   : > { %1546 = vmatmul.bf16.gmra.mxu0 %v3521_v54  ;;  %1565 = vmatmul.bf16.gmra.mxu1 %v3523_v47  ;;  %v2951_v54 = vld [vmem:[#allocation7 + $0x28] sm:$0xff] }
 0x119   : > { %v2959_v47 = vld [vmem:[#allocation7 + $0x68] sm:$0xff] }
 0x11a   : > { %1805 = vmatpush.bf16.msra.mxu0 %v2951_v54  ;;  %1824 = vmatpush.bf16.msra.mxu1 %v2959_v47 }
 0x11e   : > { %1806 = vmatpush.bf16.msra.mxu0 %v2950_v14  ;;  %1825 = vmatpush.bf16.msra.mxu1 %v2958_v15 }
 0x122   : > { %1807 = vmatpush.bf16.msra.mxu0 %v2949_v16  ;;  %1826 = vmatpush.bf16.msra.mxu1 %v2957_v17 }
 0x126   : > { %1808 = vmatpush.bf16.msra.mxu0 %v2948_v24  ;;  %1827 = vmatpush.bf16.msra.mxu1 %v2956_v25 }
 0x127   : > { %1579 = vmatmul.bf16.vlgmr.msrb.gmra.mxu2 %v1065_v30  ;;  %1598 = vmatmul.bf16.vlgmr.msrb.gmra.mxu3 %v1066_v44  ;;  %v1622_v44 = vpack.c.b16 %v1620_v42, %v1620_v42 }
 0x129   : > { %v1625_v48 = vpack.i.b16 %v1622_v44, %v1622_v44 }
 0x12a   : > { %1809 = vmatpush.bf16.msra.mxu0 %v2947_v27  ;;  %1828 = vmatpush.bf16.msra.mxu1 %v2955_v29 }
 0x12b   : > { %v1627_v8 = vperm.slane %v1625_v48, 0 }
 0x12e   : > { %1810 = vmatpush.bf16.msra.mxu0 %v2946_v35  ;;  %1829 = vmatpush.bf16.msra.mxu1 %v2954_v37 }
 0x137   : > { %1584 = vmatmul.bf16.gmra.mxu2 %v1069_v28  ;;  %1603 = vmatmul.bf16.gmra.mxu3 %v1070_v0 }
 0x164   : > { %v1466_v1 = vpop.f32.mrf.mxu0  ;;  %v1485_v2 = vpop.f32.mrf.mxu1 }
 0x165   : > { %v1486_v30 = vadd.f32 %v1485_v2, %v1466_v1  ;;  %v2968_v1 = vld [vmem:[%s3637_s5 + $0x30] sm:$0xff] }
 0x166   : > { %1935 = vmatpush.bf16.msra.mxu2 %v2968_v1 }
 0x16c   : > { %v3537_v4 = vpop.f32.mrf.mxu0  ;;  %v3539_v5 = vpop.f32.mrf.mxu1 }
 0x16d   : > { %v1488_v59 = vadd.f32 %v3539_v5, %v3537_v4  ;;  %v1640_v4 = vunpack.c.l.bf16 %v1627_v8 }
 0x174   : > { %v3541_v12 = vpop.f32.mrf.mxu0  ;;  %v3543_v13 = vpop.f32.mrf.mxu1 }
 0x17c   : > { %v3545_v21 = vpop.f32.mrf.mxu0  ;;  %v3547_v22 = vpop.f32.mrf.mxu1 }
 0x185   : > { %v1542_v23 = vpop.f32.mrf.mxu0  ;;  %v1561_v38 = vpop.f32.mrf.mxu1 }
 0x186   : > { %v1562_v20 = vadd.f32 %v1561_v38, %v1542_v23 }
 0x18a   : > { %v1504_v10 = vpop.f32.mrf.mxu2  ;;  %v1523_v11 = vpop.f32.mrf.mxu3 }
 0x18b   : > { %v1505_v50 = vadd.f32 %v1504_v10, %v1486_v30  ;;  %v2967_v10 = vld [vmem:[%s3637_s5 + $0x28] sm:$0xff] }
 0x18c   : > { %1936 = vmatpush.bf16.msra.mxu2 %v2967_v10 }
 0x18d   : > { %v1544_v45 = vpop.f32.mrf.mxu0  ;;  %v1563_v46 = vpop.f32.mrf.mxu1  ;;  %v1524_v58 = vadd.f32 %v1523_v11, %v1505_v50  ;;  %v1491_v11 = vadd.f32 %v3543_v13, %v3541_v12  ;;  %v1493_v12 = vadd.f32 %v3547_v22, %v3545_v21 }
 0x18e   : > { %v1564_v61 = vadd.f32 %v1563_v46, %v1544_v45 }
 0x192   : > { %v1506_v18 = vpop.f32.mrf.mxu2  ;;  %v1525_v19 = vpop.f32.mrf.mxu3 }
 0x193   : > { %v1507_v36 = vadd.f32 %v1506_v18, %v1488_v59 }
 0x195   : > { %v1547_v2 = vpop.f32.mrf.mxu0  ;;  %v1566_v62 = vpop.f32.mrf.mxu1  ;;  %v1526_v5 = vadd.f32 %v1525_v19, %v1507_v36  ;;  %v2965_v36 = vld [vmem:[%s3637_s5 + $0x18] sm:$0xff] }
 0x196   : > { %v1567_v15 = vadd.f32 %v1566_v62, %v1547_v2  ;;  %v1674_v2 = vld [vmem:[%s3633_s1 + $0x4] ss:$0 sm:$0xff] }
 0x19a   : > { %v1509_v31 = vpop.f32.mrf.mxu2  ;;  %v3552_v32 = vpop.f32.mrf.mxu3 }
 0x19b   : > { %v1510_v19 = vadd.f32 %v1509_v31, %v1491_v11 }
 0x19d   : > { %v1549_v38 = vpop.f32.mrf.mxu0  ;;  %v1568_v39 = vpop.f32.mrf.mxu1  ;;  %v1529_v13 = vadd.f32 %v3552_v32, %v1510_v19 }
 0x19e   : > { %v1569_v30 = vadd.f32 %v1568_v39, %v1549_v38 }
 0x1a2   : > { %v3554_v40 = vpop.f32.mrf.mxu2  ;;  %v3556_v41 = vpop.f32.mrf.mxu3 }
 0x1a3   : > { %v1512_v31 = vadd.f32 %v3554_v40, %v1493_v12 }
 0x1a5   : > { %v1531_v49 = vadd.f32 %v3556_v41, %v1512_v31  ;;  %v2966_v41 = vld [vmem:[%s3637_s5 + $0x20] sm:$0xff] }
 0x1a6   : > { %1937 = vmatpush.bf16.msra.mxu2 %v2966_v41  ;;  %v1869_v31 = vld [vmem:[%s3633_s1 + $0x5] ss:$0 sm:$0xff] }
 0x1aa   : > { %v1580_v51 = vpop.f32.mrf.mxu2  ;;  %v1599_v52 = vpop.f32.mrf.mxu3  ;;  %1938 = vmatpush.bf16.msra.mxu2 %v2965_v36 }
 0x1ab   : > { %v1581_v53 = vadd.f32 %v1580_v51, %v1562_v20 }
 0x1ad   : > { %v1600_v55 = vadd.f32 %v1599_v52, %v1581_v53 }
 0x1ae   : > { %1939 = vmatpush.bf16.msra.mxu2 %v2964_v9 }
 0x1af   : > { %v1609_v60 = vpack.c.bf16 %v1600_v55, %v1524_v58 }
 0x1b1   : > { %v1632_v3 = vunpack.c.l.bf16 %v1609_v60  ;;  %v1633_v6 = vunpack.c.h.bf16 %v1609_v60 }
 0x1b2   : > { %v1582_v63 = vpop.f32.mrf.mxu2  ;;  %v1601_v28 = vpop.f32.mrf.mxu3  ;;  %1940 = vmatpush.bf16.msra.mxu2 %v2963_v56 }
 0x1b3   : > { %v1583_v0 = vadd.f32 %v1582_v63, %v1564_v61  ;;  %v1642_v14 = vadd.f32 %v1640_v4, %v1632_v3  ;;  %v1643_v16 = vadd.f32 %v1641_v7, %v1633_v6  ;;  %v2962_v63 = vld [vmem:[%s3637_s5] sm:$0xff]  ;;  %v1845_v3 = vpack.c.bf16 %v1674_v2, %v1674_v2 }
 0x1b5   : > { %v1602_v54 = vadd.f32 %v1601_v28, %v1583_v0  ;;  %v1662_v33 = vmax.f32 %v1642_v14, 0.0  ;;  %v1663_v34 = vmax.f32 %v1643_v16, 0.0 }
 0x1b6   : > { %1941 = vmatpush.bf16.msra.mxu2 %v2962_v63  ;;  %v1981_v63 = vld [vmem:[%s3633_s1 + $0x6] ss:$0 sm:$0xff] }
 0x1b7   : > { %v1610_v47 = vpack.c.bf16 %v1602_v54, %v1526_v5  ;;  %v2972_v5 = vld [vmem:[#allocation8 + $0x10] sm:$0xff] }
 0x1b9   : > { %v1634_v17 = vunpack.c.l.bf16 %v1610_v47  ;;  %v1635_v18 = vunpack.c.h.bf16 %v1610_v47  ;;  %v1850_v47 = vunpack.c.l.bf16 %v1845_v3 }
 0x1ba   : > { %v1585_v24 = vpop.f32.mrf.mxu2  ;;  %v1604_v25 = vpop.f32.mrf.mxu3 }
 0x1bb   : > { %v1644_v26 = vadd.f32 %v1640_v4, %v1634_v17  ;;  %v1645_v27 = vadd.f32 %v1641_v7, %v1635_v18  ;;  %v1586_v29 = vadd.f32 %v1585_v24, %v1567_v15 }
 0x1bd   : > { %v1664_v35 = vmax.f32 %v1644_v26, 0.0  ;;  %v1665_v37 = vmax.f32 %v1645_v27, 0.0  ;;  %v1605_v23 = vadd.f32 %v1604_v25, %v1586_v29 }
 0x1bf   : > { %v1670_v42 = vpack.c.bf16 %v1664_v35, %v1662_v33  ;;  %v1671_v43 = vpack.c.bf16 %v1665_v37, %v1663_v34  ;;  %v1611_v44 = vpack.c.bf16 %v1605_v23, %v1529_v13 }
 0x1c1   : > { %1811 = vmatmul.bf16.vlgmr.msra.gmra.mxu0 %v1670_v42  ;;  %1830 = vmatmul.bf16.vlgmr.msra.gmra.mxu1 %v1671_v43  ;;  %v1636_v50 = vunpack.c.l.bf16 %v1611_v44  ;;  %v1637_v51 = vunpack.c.h.bf16 %v1611_v44  ;;  %v2971_v43 = vld [vmem:[#allocation8 + $0x8] sm:$0xff] }
 0x1c2   : > { %v1587_v20 = vpop.f32.mrf.mxu2  ;;  %v1606_v46 = vpop.f32.mrf.mxu3 }
 0x1c3   : > { %v1588_v45 = vadd.f32 %v1587_v20, %v1569_v30  ;;  %v1646_v32 = vadd.f32 %v1640_v4, %v1636_v50  ;;  %v1647_v48 = vadd.f32 %v1641_v7, %v1637_v51  ;;  %v2970_v30 = vld [vmem:[#allocation8] sm:$0xff] }
 0x1c5   : > { %v1607_v52 = vadd.f32 %v1606_v46, %v1588_v45  ;;  %v1666_v58 = vmax.f32 %v1646_v32, 0.0  ;;  %v1667_v59 = vmax.f32 %v1647_v48, 0.0  ;;  %v1957_v45 = vpack.c.bf16 %v1869_v31, %v1869_v31 }
 0x1c7   : > { %v1612_v53 = vpack.c.bf16 %v1607_v52, %v1531_v49  ;;  %v1962_v49 = vunpack.c.l.bf16 %v1957_v45 }
 0x1c9   : > { %v1638_v21 = vunpack.c.l.bf16 %v1612_v53  ;;  %v1639_v22 = vunpack.c.h.bf16 %v1612_v53 }
 0x1cb   : > { %v1648_v55 = vadd.f32 %v1640_v4, %v1638_v21  ;;  %v1649_v57 = vadd.f32 %v1641_v7, %v1639_v22  ;;  %v2973_v4 = vld [vmem:[#allocation8 + $0x18] sm:$0xff] }
 0x1cc   : > { %2025 = vmatpush.bf16.msra.mxu3 %v2973_v4 }
 0x1cd   : > { %v1668_v40 = vmax.f32 %v1648_v55, 0.0  ;;  %v1669_v60 = vmax.f32 %v1649_v57, 0.0 }
 0x1cf   : > { %v1672_v8 = vpack.c.bf16 %v1668_v40, %v1666_v58  ;;  %v1673_v61 = vpack.c.bf16 %v1669_v60, %v1667_v59 }
 0x1d0   : > { %2026 = vmatpush.bf16.msra.mxu3 %v2972_v5 }
 0x1d1   : > { %1816 = vmatmul.bf16.gmra.mxu0 %v1672_v8  ;;  %1835 = vmatmul.bf16.gmra.mxu1 %v1673_v61 }
 0x1d4   : > { %2027 = vmatpush.bf16.msra.mxu3 %v2971_v43 }
 0x1d8   : > { %2028 = vmatpush.bf16.msra.mxu3 %v2970_v30 }
 0x23e   : > { %v1812_v28 = vpop.f32.mrf.mxu0  ;;  %v1831_v0 = vpop.f32.mrf.mxu1 }
 0x23f   : > { %v1832_v1 = vadd.f32 %v1831_v0, %v1812_v28 }
 0x241   : > { %v1841_v62 = vpack.c.bf16 %v1832_v1, %v1832_v1 }
 0x243   : > { %v1846_v54 = vunpack.c.l.bf16 %v1841_v62 }
 0x245   : > { %v1851_v14 = vadd.f32 %v1850_v47, %v1846_v54 }
 0x246   : > { %v1814_v6 = vpop.f32.mrf.mxu0  ;;  %v1833_v7 = vpop.f32.mrf.mxu1 }
 0x247   : > { %v1834_v10 = vadd.f32 %v1833_v7, %v1814_v6  ;;  %v1863_v24 = vmax.f32 %v1851_v14, 0.0 }
 0x249   : > { %v1842_v11 = vpack.c.bf16 %v1834_v10, %v1834_v10 }
 0x24b   : > { %v1847_v15 = vunpack.c.l.bf16 %v1842_v11 }
 0x24d   : > { %v1852_v16 = vadd.f32 %v1850_v47, %v1847_v15 }
 0x24e   : > { %v1817_v17 = vpop.f32.mrf.mxu0  ;;  %v1836_v18 = vpop.f32.mrf.mxu1 }
 0x24f   : > { %v1864_v25 = vmax.f32 %v1852_v16, 0.0  ;;  %v1837_v19 = vadd.f32 %v1836_v18, %v1817_v17 }
 0x251   : > { %v1867_v26 = vpack.c.bf16 %v1864_v25, %v1863_v24  ;;  %v1843_v27 = vpack.c.bf16 %v1837_v19, %v1837_v19 }
 0x253   : > { %1942 = vmatmul.bf16.vlgmr.msra.gmra.mxu2 %v1867_v26  ;;  %v1848_v34 = vunpack.c.l.bf16 %v1843_v27 }
 0x255   : > { %v1853_v23 = vadd.f32 %v1850_v47, %v1848_v34 }
 0x256   : > { %v1819_v29 = vpop.f32.mrf.mxu0  ;;  %v1838_v33 = vpop.f32.mrf.mxu1 }
 0x257   : > { %v1839_v35 = vadd.f32 %v1838_v33, %v1819_v29  ;;  %v1865_v12 = vmax.f32 %v1853_v23, 0.0 }
 0x259   : > { %v1844_v37 = vpack.c.bf16 %v1839_v35, %v1839_v35 }
 0x25b   : > { %v1849_v38 = vunpack.c.l.bf16 %v1844_v37 }
 0x25d   : > { %v1854_v39 = vadd.f32 %v1850_v47, %v1849_v38 }
 0x25f   : > { %v1866_v13 = vmax.f32 %v1854_v39, 0.0 }
 0x261   : > { %v1868_v42 = vpack.c.bf16 %v1866_v13, %v1865_v12 }
 0x263   : > { %1947 = vmatmul.bf16.gmra.mxu2 %v1868_v42 }
 0x2d6   : > { %v1943_v44 = vpop.f32.mrf.mxu2 }
 0x2d7   : > { %v1953_v20 = vpack.c.bf16 %v1943_v44, %v1943_v44 }
 0x2d9   : > { %v1958_v46 = vunpack.c.l.bf16 %v1953_v20 }
 0x2db   : > { %v1963_v52 = vadd.f32 %v1962_v49, %v1958_v46 }
 0x2dd   : > { %v1975_v22 = vmax.f32 %v1963_v52, 0.0 }
 0x2de   : > { %v1945_v50 = vpop.f32.mrf.mxu2 }
 0x2df   : > { %v1954_v51 = vpack.c.bf16 %v1945_v50, %v1945_v50 }
 0x2e1   : > { %v1959_v53 = vunpack.c.l.bf16 %v1954_v51 }
 0x2e3   : > { %v1964_v21 = vadd.f32 %v1962_v49, %v1959_v53 }
 0x2e5   : > { %v1976_v32 = vmax.f32 %v1964_v21, 0.0 }
 0x2e6   : > { %v1948_v48 = vpop.f32.mrf.mxu2 }
 0x2e7   : > { %v1979_v55 = vpack.c.bf16 %v1976_v32, %v1975_v22  ;;  %v1955_v57 = vpack.c.bf16 %v1948_v48, %v1948_v48 }
 0x2e9   : > { %2810 = vmatmul.msk.bf16.vlgmr.msra.gmra.mxu3 %vm2014_vm0, %v1979_v55  ;;  %v1960_v58 = vunpack.c.l.bf16 %v1955_v57 }
 0x2eb   : > { %v1965_v60 = vadd.f32 %v1962_v49, %v1960_v58 }
 0x2ed   : > { %v1977_v41 = vmax.f32 %v1965_v60, 0.0 }
 0x2ee   : > { %v1950_v40 = vpop.f32.mrf.mxu2 }
 0x2ef   : > { %v1956_v59 = vpack.c.bf16 %v1950_v40, %v1950_v40 }
 0x2f1   : > { %v1961_v8 = vunpack.c.l.bf16 %v1956_v59 }
 0x2f3   : > { %v1966_v61 = vadd.f32 %v1962_v49, %v1961_v8 }
 0x2f5   : > { %v1978_v36 = vmax.f32 %v1966_v61, 0.0 }
 0x2f7   : > { %v1980_v9 = vpack.c.bf16 %v1978_v36, %v1977_v41 }
 0x2f9   : > { %2811 = vmatmul.msk.bf16.gmra.mxu3 %vm2014_vm0, %v1980_v9 }
 0x36c   : > { %v2030_v56 = vpop.f32.mrf.mxu3 }
 0x36d   : > { %v2031_v0 = vadd.f32 %v2030_v56, %v1981_v63 }
 0x374   : > { %v2032_v28 = vpop.f32.mrf.mxu3 }
 0x375   : > { %v2033_v1 = vadd.f32 %v2032_v28, %v1981_v63 }
 0x377   : > { %v2978_v2 = vpack.c.bf16 %v2033_v1, %v2031_v0 }
 0x379   : > { %2979 = vst [vmem:[%s341_s26] sm:$0xff] %v2978_v2  }
 0x37c   : > { %v2035_v62 = vpop.f32.mrf.mxu3 }
 0x37d   : > { %v2036_v4 = vadd.f32 %v2035_v62, %v1981_v63 }
 0x384   : > { %v2037_v3 = vpop.f32.mrf.mxu3 }
 0x385   : > { %v2038_v5 = vadd.f32 %v2037_v3, %v1981_v63 }
 0x387   : > { %v2983_v6 = vpack.c.bf16 %v2038_v5, %v2036_v4 }
 0x389   : > { %2985 = vst [vmem:[%s341_s26 + $0x8] sm:$0xff] %v2983_v6  }
 0x38a   : > { %3221 = shalt.err (!%p3218_p8)
}
 0x38b   : > { %s3280_s29 = smov 64   ;;  %s3281_s8 = smov 4  }
 0x38c   : > { %3002 = dma.vmem_to_hbm [thread:$0]  (%p3360_p5), %s2062_s9, 256, %s2064_s14, %s2049_s15, %s3280_s29, %s3280_s29, %s3281_s8  }
 0x38d PF: > { %p3029_p9 = scmp.ge.s32.totalorder %s3268_s27, 2  ;;  %s2078_s2 = sand.u32 1, %s3256_s24  }
 0x38e   : > { %s2079_s3 = scalar_lea.sflag [#allocation4], %s2078_s2 }
 0x38f   : > { %p3018_p10 = pnand %p3029_p9, %p3364_p6 }
 0x391   : > { %p3019_p11 = pneg %p3018_p10 }
 0x393   : > { %3251 = dma.done.wait (%p3019_p11), %s2079_s3, 256  }
 0x394   : > { %3253 = vsyncadd (%p3019_p11), %s2079_s3, 4294967040  ;;  %s3652_s26 = sld [smem:[#allocation15_spill]]  ;;  %p20_p12 = scmp.ge.s32.totalorder %s3347_s30, 4  }
 0x395   : > { %s3653_s10 = sld [smem:[#allocation16_spill]]  ;;  %s3654_s24 = smov %s3260_s25 }
 0x396   : > { %s3657_s27 = smov %s3347_s30 }
 0x397   :  { %22 = sbr.rel (!%p20_p12) target bundleno = 9 (0x9), region = 103 }
 0x39a   : > { %s3655_s25 = smov %s3652_s26 }
 0x39b   : > { %s3656_s26 = smov %s3653_s10 }
 0x39c   :  { %2085 = vsyncpa [#allocation3], 1 }
 0x39d   :  { %2087 = vsyncpa [#allocation3 + $0x1], 1 }
 0x39e   :  { %2088 = vsyncpa [#allocation6], 1 }
 0x39f   :  { %2089 = vsyncpa [#allocation9], 1 }
 0x3a0   :  { %2090 = vsyncpa [#allocation4], 1 }
 0x3a1   :  { %2092 = vsyncpa [#allocation4 + $0x1], 1 }

</bundles_post_ra>
